<compile_context>
chip_gen: v7x
topology: tpu7x:2x2x1
jax: 0.10.0
libtpu: 0.0.40
codegen_flags: <defaults>
</compile_context>

<pallas_src>
import jax
import jax.numpy as jnp
from jax import lax
from jax.experimental import pallas as pl
from jax.experimental.pallas import tpu as pltpu

# config['hyperparameters'] (small, deterministic, synthetic)
VOCAB = 50
EMB_DIM = 32        # embedding size D
ATT_UNIT = 16       # attention-unit (da)
ATT_HOPS = 2        # attention-hops (r)
CLASSES = 4
PAD_IDX = 1         # vocab.stoi['<pad>']

TILE_N = 512        # rows of N=B*T per grid step (safe under v5e's 16 MiB scoped VMEM)


def _round_up(x, m):
    return ((x + m - 1) // m) * m


def _self_att_kernel(ids_ref, whi_ref, wlo_ref, ws2t_ref, out_ref):
    """One tile of `tn` flattened (B*T) rows; one lane-dense packed output block.

    Packed output columns: [h_hop0 (D) | a_hop0 (L) | h_hop1 (D) | a_hop1 (L) | 0-pad].
    """
    tn, L = ids_ref.shape
    nl = tn * L
    v_pad = whi_ref.shape[0]

    ids = ids_ref[...]                                              # [tn, L] int32
    ids3 = ids[:, :, None]                                          # [tn, L, 1] (L -> sublanes)

    # ---- Embedding gather + Ws1 projection as ONE fused bf16 MXU matmul ----
    # one-hot is exact in bf16 (0/1); hi/lo weight split keeps ~f32 accuracy.
    iota_v = lax.broadcasted_iota(jnp.int32, (tn, L, v_pad), 2)
    onehot = (ids3 == iota_v).astype(jnp.bfloat16)                  # [tn, L, Vp]
    oh2 = onehot.reshape(nl, v_pad)                                 # free leading-dim collapse
    fused = (jnp.dot(oh2, whi_ref[...], preferred_element_type=jnp.float32) +
             jnp.dot(oh2, wlo_ref[...], preferred_element_type=jnp.float32))
    # fused: [nl, D+A] = [emb | emb @ Ws1^T]
    emb2 = fused[:, :EMB_DIM]                                       # [nl, D]
    hbar2 = jnp.tanh(fused[:, EMB_DIM:EMB_DIM + ATT_UNIT])          # [nl, A]

    # ---- Scores for both hops at once (MXU); L stays on the sublane axis ----
    scores3 = jnp.dot(hbar2, ws2t_ref[...],
                      preferred_element_type=jnp.float32).reshape(tn, L, ATT_HOPS)
    pen = scores3 + jnp.where(ids3 == PAD_IDX, -10000.0, 0.0)       # pad penalty, as in ref

    # ---- Softmax over L: sublane reduces + one reciprocal per row ----
    m = jnp.max(pen, axis=1, keepdims=True)                         # [tn, 1, H]
    e = jnp.exp(pen - m)                                            # [tn, L, H]
    s = jnp.sum(e, axis=1, keepdims=True)                           # [tn, 1, H]
    alphas = e * pl.reciprocal(s, approx=False)                     # exact (sum-to-1 check)

    # ---- Weighted sums; identity trick emits attention already lane-dense ----
    # aug = [emb | I_L]  =>  sum_l alphas*aug = [h_hop (D lanes) | alpha_hop (L lanes)]
    emb3 = emb2.reshape(tn, L, EMB_DIM)                             # [tn, L, D]
    eye3 = (lax.broadcasted_iota(jnp.int32, (tn, L, L), 1) ==
            lax.broadcasted_iota(jnp.int32, (tn, L, L), 2)).astype(jnp.float32)
    aug = jnp.concatenate([emb3, eye3], axis=-1)                    # [tn, L, D+L]

    pieces = [jnp.sum(alphas[:, :, hop:hop + 1] * aug, axis=1)      # [tn, D+L]
              for hop in range(ATT_HOPS)]
    pad_w = out_ref.shape[-1] - ATT_HOPS * (EMB_DIM + L)
    if pad_w > 0:
        pieces.append(jnp.zeros((tn, pad_w), jnp.float32))
    out_ref[...] = jnp.concatenate(pieces, axis=-1)                 # one dense 128-lane store


def sel_att_text_only_forward(tokens, params, *, tile_n=TILE_N):
    """tokens: int32 [B, T, L] (already padded with PAD_IDX, like prepare_inp)."""
    B, T, L = tokens.shape
    N = B * T
    flat = tokens.reshape(N, L).astype(jnp.int32)                   # [N, L]

    # Row-tile: multiple of 8 sublanes; for large N keep >=4 grid steps so the
    # "parallel" axis shards across both TensorCores on v7x and still pipelines.
    tn = min(tile_n, _round_up(N, 8))
    if N >= 4 * 256:
        tn = min(tn, max(256, _round_up((N + 3) // 4, 8)))
    n_pad = _round_up(N, tn)
    if n_pad != N:
        flat = jnp.pad(flat, ((0, n_pad - N), (0, 0)), constant_values=PAD_IDX)

    # Fused weight [table | table @ Ws1^T]; vocab padded to a full 128-lane K dim.
    v_pad = _round_up(VOCAB, 128)
    table = jnp.zeros((v_pad, EMB_DIM), jnp.float32).at[:VOCAB].set(params["embedding"])
    w_fused = jnp.concatenate([table, table @ params["ws1"].T], axis=1)   # [v_pad, D+A]
    w_hi = w_fused.astype(jnp.bfloat16)
    w_lo = (w_fused - w_hi.astype(jnp.float32)).astype(jnp.bfloat16)
    ws2_t = params["ws2"].T                                               # [A, H]

    pack_w = _round_up(ATT_HOPS * (EMB_DIM + L), 128)               # lane-dense output width
    grid = (n_pad // tn,)
    packed = pl.pallas_call(
        _self_att_kernel,
        out_shape=jax.ShapeDtypeStruct((n_pad, pack_w), jnp.float32),
        grid=grid,
        in_specs=[
            pl.BlockSpec((tn, L), lambda i: (i, 0)),                         # token ids
            pl.BlockSpec((v_pad, EMB_DIM + ATT_UNIT), lambda i: (0, 0)),     # w_hi (bf16)
            pl.BlockSpec((v_pad, EMB_DIM + ATT_UNIT), lambda i: (0, 0)),     # w_lo (bf16)
            pl.BlockSpec((ATT_UNIT, ATT_HOPS), lambda i: (0, 0)),            # Ws2^T
        ],
        out_specs=pl.BlockSpec((tn, pack_w), lambda i: (i, 0)),
        compiler_params=pltpu.CompilerParams(
            dimension_semantics=("parallel",),
            vmem_limit_bytes=32 << 20),
    )(flat, w_hi, w_lo, ws2_t)

    packed = packed[:N]                                              # drop pad rows
    h0 = packed[:, 0:EMB_DIM]
    a0 = packed[:, EMB_DIM:EMB_DIM + L]
    h1 = packed[:, EMB_DIM + L:2 * EMB_DIM + L]
    a1 = packed[:, 2 * EMB_DIM + L:2 * (EMB_DIM + L)]

    # Final linear (C=4 lanes) stays in plain JAX on the lane-dense h slab.
    r = jnp.concatenate([h0, h1], axis=-1).reshape(B, T, ATT_HOPS * EMB_DIM)  # hop-major
    logits = r @ params["final_w"].T + params["final_b"]             # [B, T, C]
    attention = jnp.stack([a0, a1], axis=1)                          # [N, H, L]
    return logits, attention


def _reference_forward(tokens, params):
    """Pure-JAX reference implementing the PyTorch semantics."""
    B, T, L = tokens.shape
    flat = tokens.reshape(-1, L)
    emb = params["embedding"][flat]                                  # [N, L, D]
    hbar = jnp.tanh(emb @ params["ws1"].T)                           # [N, L, A]
    scores = jnp.einsum("nla,ha->nhl", hbar, params["ws2"])          # [N, H, L]
    pen = scores + (-10000.0) * (flat == PAD_IDX)[:, None, :].astype(jnp.float32)
    alphas = jax.nn.softmax(pen, axis=-1)                            # [N, H, L]
    h = jnp.einsum("nhl,nld->nhd", alphas, emb)                      # [N, H, D]
    r = h.reshape(B, T, ATT_HOPS * EMB_DIM)
    logits = r @ params["final_w"].T + params["final_b"]
    return logits, alphas


def init_params(key):
    k0, k1, k2, k3, k4 = jax.random.split(key, 5)
    embedding = 0.1 * jax.random.normal(k0, (VOCAB, EMB_DIM), jnp.float32)
    embedding = embedding.at[PAD_IDX].set(0.0)                       # padding_idx row
    ws1 = 0.1 * jax.random.normal(k1, (ATT_UNIT, EMB_DIM), jnp.float32)   # Linear(D->A, no bias)
    ws2 = 0.1 * jax.random.normal(k2, (ATT_HOPS, ATT_UNIT), jnp.float32)  # Linear(A->H, no bias)
    final_w = 0.1 * jax.random.normal(k3, (CLASSES, ATT_HOPS * EMB_DIM), jnp.float32)
    final_b = 0.1 * jax.random.normal(k4, (CLASSES,), jnp.float32)
    return dict(embedding=embedding, ws1=ws1, ws2=ws2,
                final_w=final_w, final_b=final_b)


def _make_tokens(key, B, T, L):
    tkey, lkey = jax.random.split(key)
    tokens = jax.random.randint(tkey, (B, T, L), 2, VOCAB, dtype=jnp.int32)
    lengths = jax.random.randint(lkey, (B, T), 1, L + 1, dtype=jnp.int32)
    pos = jnp.arange(L)[None, None, :]
    return jnp.where(pos < lengths[..., None], tokens, PAD_IDX)


def _check(tokens, params, *, tile_n=TILE_N):
    B, T, L = tokens.shape
    logits, attention = sel_att_text_only_forward(tokens, params, tile_n=tile_n)
    jax.block_until_ready((logits, attention))
    assert logits.shape == (B, T, CLASSES)
    assert attention.shape == (B * T, ATT_HOPS, L)
    assert bool(jnp.all(jnp.isfinite(logits)))
    assert bool(jnp.allclose(attention.sum(-1), 1.0, atol=1e-5))
    ref_logits, ref_attn = _reference_forward(tokens, params)
    assert bool(jnp.allclose(logits, ref_logits, atol=1e-3, rtol=1e-3))
    assert bool(jnp.allclose(attention, ref_attn, atol=1e-3, rtol=1e-3))


if __name__ == "__main__":
    key = jax.random.PRNGKey(0)
    pkey, k1, k2 = jax.random.split(key, 3)
    params = init_params(pkey)

    # Synthetic "batch": B examples, T texts per example, maxlen L tokens,
    # ragged lengths padded with <pad> (what prepare_inp produces).
    _check(_make_tokens(k1, 2, 3, 16), params)                       # single-tile path
    _check(_make_tokens(k2, 4, 8, 16), params, tile_n=16)            # multi-step grid path

    print("KERNEL_OK")
</pallas_src>

<mosaic_0001>
module attributes {stable_mosaic.version = 11 : i64} {
  func.func @_self_att_kernel(%arg0: i32, %arg1: memref<8x16xi32, #tpu.memory_space<vmem>>, %arg2: memref<128x48xbf16, #tpu.memory_space<vmem>>, %arg3: memref<128x48xbf16, #tpu.memory_space<vmem>>, %arg4: memref<16x2xf32, #tpu.memory_space<vmem>>, %arg5: memref<8x128xf32, #tpu.memory_space<vmem>>) attributes {dimension_semantics = [#tpu.dimension_semantics<parallel>], iteration_bounds = array<i64: 1>, scalar_prefetch = 0 : i64, scratch_operands = 0 : i64, tpu.core_type = #tpu.core_type<tc>, window_params = [{transform_indices = @transform_0, window_bounds = array<i64: 8, 16>}, {pipeline_mode = #tpu.pipeline_mode<synchronous>, transform_indices = @transform_1, window_bounds = array<i64: 128, 48>}, {pipeline_mode = #tpu.pipeline_mode<synchronous>, transform_indices = @transform_2, window_bounds = array<i64: 128, 48>}, {pipeline_mode = #tpu.pipeline_mode<synchronous>, transform_indices = @transform_3, window_bounds = array<i64: 16, 2>}, {transform_indices = @transform_4, window_bounds = array<i64: 8, 128>}]} {
    %c0 = arith.constant 0 : index
    %c0_0 = arith.constant 0 : index
    %0 = vector.load %arg1[%c0, %c0_0] : memref<8x16xi32, #tpu.memory_space<vmem>>, vector<8x16xi32>
    %1 = vector.shape_cast %0 : vector<8x16xi32> to vector<8x16x1xi32>
    %2 = tpu.iota {dimensions = array<i32: 2>} : vector<8x16x128xi32>
    %3 = vector.broadcast %1 : vector<8x16x1xi32> to vector<8x16x128xi32>
    %4 = arith.cmpi eq, %3, %2 : vector<8x16x128xi32>
    %5 = arith.extui %4 : vector<8x16x128xi1> to vector<8x16x128xi32>
    %6 = arith.sitofp %5 : vector<8x16x128xi32> to vector<8x16x128xf32>
    %7 = arith.truncf %6 : vector<8x16x128xf32> to vector<8x16x128xbf16>
    %8 = vector.shape_cast %7 : vector<8x16x128xbf16> to vector<128x128xbf16>
    %c0_1 = arith.constant 0 : index
    %c0_2 = arith.constant 0 : index
    %9 = vector.load %arg2[%c0_1, %c0_2] : memref<128x48xbf16, #tpu.memory_space<vmem>>, vector<128x48xbf16>
    %cst = arith.constant dense<0.000000e+00> : vector<128x48xf32>
    %10 = tpu.matmul %8, %9, %cst {dimension_numbers = #tpu.dot_dimension_numbers<[1], [0], [0], [1], [0, 0, 1, 1], [], []>} : vector<128x128xbf16>, vector<128x48xbf16>, vector<128x48xf32> -> vector<128x48xf32>
    %c0_3 = arith.constant 0 : index
    %c0_4 = arith.constant 0 : index
    %11 = vector.load %arg3[%c0_3, %c0_4] : memref<128x48xbf16, #tpu.memory_space<vmem>>, vector<128x48xbf16>
    %cst_5 = arith.constant dense<0.000000e+00> : vector<128x48xf32>
    %12 = tpu.matmul %8, %11, %cst_5 {dimension_numbers = #tpu.dot_dimension_numbers<[1], [0], [0], [1], [0, 0, 1, 1], [], []>} : vector<128x128xbf16>, vector<128x48xbf16>, vector<128x48xf32> -> vector<128x48xf32>
    %13 = arith.addf %10, %12 : vector<128x48xf32>
    %14 = vector.extract_strided_slice %13 {offsets = [0, 0], sizes = [128, 32], strides = [1, 1]} : vector<128x48xf32> to vector<128x32xf32>
    %15 = vector.extract_strided_slice %13 {offsets = [0, 32], sizes = [128, 16], strides = [1, 1]} : vector<128x48xf32> to vector<128x16xf32>
    %16 = math.tanh %15 : vector<128x16xf32>
    %c0_6 = arith.constant 0 : index
    %c0_7 = arith.constant 0 : index
    %17 = vector.load %arg4[%c0_6, %c0_7] : memref<16x2xf32, #tpu.memory_space<vmem>>, vector<16x2xf32>
    %cst_8 = arith.constant dense<0.000000e+00> : vector<128x2xf32>
    %18 = tpu.matmul %16, %17, %cst_8 {dimension_numbers = #tpu.dot_dimension_numbers<[1], [0], [0], [1], [0, 0, 1, 1], [], []>} : vector<128x16xf32>, vector<16x2xf32>, vector<128x2xf32> -> vector<128x2xf32>
    %19 = vector.shape_cast %18 : vector<128x2xf32> to vector<8x16x2xf32>
    %c1_i32 = arith.constant 1 : i32
    %20 = vector.broadcast %c1_i32 : i32 to vector<8x16x1xi32>
    %21 = arith.cmpi eq, %1, %20 : vector<8x16x1xi32>
    %cst_9 = arith.constant -1.000000e+04 : f32
    %cst_10 = arith.constant 0.000000e+00 : f32
    %22 = vector.broadcast %cst_9 : f32 to vector<8x16x1xf32>
    %23 = vector.broadcast %cst_10 : f32 to vector<8x16x1xf32>
    %24 = arith.select %21, %22, %23 : vector<8x16x1xi1>, vector<8x16x1xf32>
    %25 = vector.broadcast %24 : vector<8x16x1xf32> to vector<8x16x2xf32>
    %26 = arith.addf %19, %25 : vector<8x16x2xf32>
    %cst_11 = arith.constant dense<0xFF800000> : vector<8x2xf32>
    %27 = vector.multi_reduction <maximumf>, %26, %cst_11 [1] : vector<8x16x2xf32> to vector<8x2xf32>
    %28 = vector.shape_cast %27 : vector<8x2xf32> to vector<8x1x2xf32>
    %29 = vector.broadcast %28 : vector<8x1x2xf32> to vector<8x16x2xf32>
    %30 = arith.subf %26, %29 : vector<8x16x2xf32>
    %31 = math.exp %30 : vector<8x16x2xf32>
    %cst_12 = arith.constant dense<0.000000e+00> : vector<8x2xf32>
    %32 = vector.multi_reduction <add>, %31, %cst_12 [1] : vector<8x16x2xf32> to vector<8x2xf32>
    %33 = vector.shape_cast %32 : vector<8x2xf32> to vector<8x1x2xf32>
    %34 = tpu.reciprocal %33 : vector<8x1x2xf32> -> vector<8x1x2xf32>
    %35 = vector.broadcast %34 : vector<8x1x2xf32> to vector<8x16x2xf32>
    %36 = arith.mulf %31, %35 : vector<8x16x2xf32>
    %37 = vector.shape_cast %14 : vector<128x32xf32> to vector<8x16x32xf32>
    %38 = tpu.iota {dimensions = array<i32: 1>} : vector<8x16x16xi32>
    %39 = tpu.iota {dimensions = array<i32: 2>} : vector<8x16x16xi32>
    %40 = arith.cmpi eq, %38, %39 : vector<8x16x16xi32>
    %41 = arith.extui %40 : vector<8x16x16xi1> to vector<8x16x16xi32>
    %42 = arith.sitofp %41 : vector<8x16x16xi32> to vector<8x16x16xf32>
    %43 = tpu.concatenate %37, %42 in 2 : vector<8x16x32xf32>, vector<8x16x16xf32> -> vector<8x16x48xf32>
    %44 = vector.extract_strided_slice %36 {offsets = [0, 0, 0], sizes = [8, 16, 1], strides = [1, 1, 1]} : vector<8x16x2xf32> to vector<8x16x1xf32>
    %45 = vector.broadcast %44 : vector<8x16x1xf32> to vector<8x16x48xf32>
    %46 = arith.mulf %45, %43 : vector<8x16x48xf32>
    %cst_13 = arith.constant dense<0.000000e+00> : vector<8x48xf32>
    %47 = vector.multi_reduction <add>, %46, %cst_13 [1] : vector<8x16x48xf32> to vector<8x48xf32>
    %48 = vector.extract_strided_slice %36 {offsets = [0, 0, 1], sizes = [8, 16, 1], strides = [1, 1, 1]} : vector<8x16x2xf32> to vector<8x16x1xf32>
    %49 = vector.broadcast %48 : vector<8x16x1xf32> to vector<8x16x48xf32>
    %50 = arith.mulf %49, %43 : vector<8x16x48xf32>
    %cst_14 = arith.constant dense<0.000000e+00> : vector<8x48xf32>
    %51 = vector.multi_reduction <add>, %50, %cst_14 [1] : vector<8x16x48xf32> to vector<8x48xf32>
    %cst_15 = arith.constant 0.000000e+00 : f32
    %52 = vector.broadcast %cst_15 : f32 to vector<8x32xf32>
    %53 = tpu.concatenate %47, %51, %52 in 1 : vector<8x48xf32>, vector<8x48xf32>, vector<8x32xf32> -> vector<8x128xf32>
    %c0_16 = arith.constant 0 : index
    %c0_17 = arith.constant 0 : index
    %54 = vector.load %arg5[%c0_16, %c0_17] : memref<8x128xf32, #tpu.memory_space<vmem>>, vector<8x128xf32>
    tpu.vector_store %arg5[%c0_16, %c0_17], %53 {strides = array<i32>} : memref<8x128xf32, #tpu.memory_space<vmem>>, vector<8x128xf32>,
    return
  }
  func.func @transform_0(%arg0: i32) -> (i32, i32) {
    %c0_i32 = arith.constant 0 : i32
    %c0_i32_0 = arith.constant 0 : i32
    return %arg0, %c0_i32 : i32, i32
  }
  func.func @transform_1(%arg0: i32) -> (i32, i32) {
    %c0_i32 = arith.constant 0 : i32
    %c0_i32_0 = arith.constant 0 : i32
    %c0_i32_1 = arith.constant 0 : i32
    return %c0_i32, %c0_i32_0 : i32, i32
  }
  func.func @transform_2(%arg0: i32) -> (i32, i32) {
    %c0_i32 = arith.constant 0 : i32
    %c0_i32_0 = arith.constant 0 : i32
    %c0_i32_1 = arith.constant 0 : i32
    return %c0_i32, %c0_i32_0 : i32, i32
  }
  func.func @transform_3(%arg0: i32) -> (i32, i32) {
    %c0_i32 = arith.constant 0 : i32
    %c0_i32_0 = arith.constant 0 : i32
    %c0_i32_1 = arith.constant 0 : i32
    return %c0_i32, %c0_i32_0 : i32, i32
  }
  func.func @transform_4(%arg0: i32) -> (i32, i32) {
    %c0_i32 = arith.constant 0 : i32
    %c0_i32_0 = arith.constant 0 : i32
    return %arg0, %c0_i32 : i32, i32
  }
}

</mosaic_0001>

<bundles_post_ra>
// kernel: tpu_custom_call.1
= control target key start
LH: loop header
LB: loop body
LE: loop exit
PB: predicated region body
PF: predicated region fallthrough
CT: control target
= control target key end

     0   :  { %v20_v0 = vlaneseq  ;;  %s2539_s0 = inlined_call_operand.vmem [shape: s32[8,16], index: 0, kind: input, shape index: {}]   ;;  %s2540_s1 = inlined_call_operand.vmem [shape: bf16[128,48], index: 1, kind: input, shape index: {}]   ;;  %s2541_s2 = inlined_call_operand.vmem [shape: bf16[128,48], index: 2, kind: input, shape index: {}]   ;;  %s2542_s3 = inlined_call_operand.vmem [shape: f32[16,2], index: 3, kind: input, shape index: {}]   ;;  %s2543_s4 = inlined_call_operand.hbm [shape: f32[8,128], index: 4, kind: output, shape index: {}]  }
   0x1   :  { %v1689_v1 = vld [vmem:[%s2541_s2] sm:$0xff]   ;;  %v1690_v4 = vld [vmem:[%s2541_s2 + $0x8] sm:$0xff]   ;;  %v1691_v7 = vld [vmem:[%s2541_s2 + $0x10] sm:$0xff]  }
   0x2   :  { %v1848_v2 = vld [vmem:[%s2539_s0] sm:$0xff]  ;;  %v1851_v3 = vshrl.u32 %v20_v0, 7  ;;  %1543 = vmatprep.subr.bf16.mxu0 %v1689_v1  ;;  %v1872_v12 = vld [vmem:[%s2540_s1 + $0x8] sm:$0xff]   ;;  %v1692_v13 = vld [vmem:[%s2541_s2 + $0x18] sm:$0xff]  }
   0x3   :  { %1544 = vmatpush3.bf16.msra.mxu0 %v1689_v1  ;;  %v1866_v10 = vld [vmem:[%s2540_s1] sm:$0xff]   ;;  %v1883_v14 = vld [vmem:[%s2540_s1 + $0x10] sm:$0xff]   ;;  %v1895_v18 = vld [vmem:[%s2540_s1 + $0x18] sm:$0xff]  }
   0x4   :  { %v33_v5 = vsub.s32 1, %v1851_v3  ;;  %v22_v6 = vsub.s32 0, %v1851_v3  ;;  %1545 = vmatprep.subr.bf16.mxu0 %v1690_v4  ;;  %v44_v11 = vsub.s32 2, %v1851_v3  ;;  %1639 = vmatprep.subr.bf16.mxu1 %v1866_v10  ;;  %v55_v16 = vsub.s32 3, %v1851_v3  ;;  %v1693_v17 = vld [vmem:[%s2541_s2 + $0x20] sm:$0xff]  }
   0x5   :  { %1647 = vmatpush3.bf16.msra.mxu1 %v1866_v10  ;;  %v66_v20 = vsub.s32 4, %v1851_v3 }
   0x6   :  { %v34_v8 = vrot.slane %v1848_v2, %v33_v5  ;;  %v23_v9 = vrot.slane %v1848_v2, %v22_v6  ;;  %1640 = vmatprep.subr.bf16.mxu1 %v1872_v12  ;;  %v45_v15 = vrot.slane %v1848_v2, %v44_v11  ;;  %v56_v19 = vrot.slane %v1848_v2, %v55_v16 }
   0x7   :  { %1546 = vmatpush3.bf16.msra.mxu0 %v1690_v4 }
   0x8   :  { %36 = vbcast.lane.b32.xlu1 %v34_v8, 256  ;;  %25 = vbcast.lane.b32.xlu0 %v23_v9, 256 }
   0x9   :  { %1547 = vmatprep.subr.bf16.mxu0 %v1691_v7  ;;  %1648 = vmatpush3.bf16.msra.mxu1 %v1872_v12 }
   0xa   :  { %1641 = vmatprep.subr.bf16.mxu1 %v1883_v14 }
   0xb   :  { %1548 = vmatpush3.bf16.msra.mxu0 %v1691_v7 }
   0xc   :  { %40 = vbcast.lane.b32.xlu1 %v34_v8, 264  ;;  %29 = vbcast.lane.b32.xlu0 %v23_v9, 264 }
   0xd   :  { %1549 = vmatprep.subr.bf16.mxu0 %v1692_v13 }
   0xf   :  { %1550 = vmatpush3.bf16.msra.mxu0 %v1692_v13 }
  0x10   :  { %51 = vbcast.lane.b32.xlu1 %v45_v15, 264  ;;  %47 = vbcast.lane.b32.xlu0 %v45_v15, 256 }
  0x11   :  { %9 = vsyncpa [#allocation3], 0  ;;  %1551 = vmatprep.subr.bf16.mxu0 %v1693_v17  ;;  %v1695_v21 = vld [vmem:[%s2541_s2 + $0x28] sm:$0xff]   ;;  %1649 = vmatpush3.bf16.msra.mxu1 %v1883_v14  ;;  %v1907_v22 = vld [vmem:[%s2540_s1 + $0x20] sm:$0xff]   ;;  %v67_v23 = vrot.slane %v1848_v2, %v66_v20  ;;  %v77_v24 = vsub.s32 5, %v1851_v3  ;;  %v88_v28 = vsub.s32 6, %v1851_v3 }
  0x12   :  { %1642 = vmatprep.subr.bf16.mxu1 %v1895_v18  ;;  %v1697_v25 = vld [vmem:[%s2541_s2 + $0x30] sm:$0xff]   ;;  %v1919_v26 = vld [vmem:[%s2540_s1 + $0x28] sm:$0xff]   ;;  %v1699_v29 = vld [vmem:[%s2541_s2 + $0x38] sm:$0xff]   ;;  %v99_v32 = vsub.s32 7, %v1851_v3  ;;  %v1952_v37 = vand.u32 127, %v20_v0  ;;  %s1812_s23 = smov 32  }
  0x13   :  { %1552 = vmatpush3.bf16.msra.mxu0 %v1693_v17  ;;  %v78_v27 = vrot.slane %v1848_v2, %v77_v24  ;;  %v1931_v30 = vld [vmem:[%s2540_s1 + $0x30] sm:$0xff]   ;;  %v89_v31 = vrot.slane %v1848_v2, %v88_v28  ;;  %v1940_v33 = vld [vmem:[%s2540_s1 + $0x38] sm:$0xff]   ;;  %v1809_v42 = vmov 1.0|1.0   ;;  %v504_v57 = vld [vmem:[%s2542_s3] sm:$0xff]  ;;  %s1815_s24 = smov 48  }
  0x14   :  { %62 = vbcast.lane.b32.xlu1 %v56_v19, 264  ;;  %58 = vbcast.lane.b32.xlu0 %v56_v19, 256  ;;  %v100_v34 = vrot.slane %v1848_v2, %v99_v32  ;;  %v505_v58 = vld [vmem:[%s2542_s3 + $0x8] sm:$0xff]  ;;  %s1810_s3 = smov 96   ;;  %s1816_s25 = smov [#allocation2]  }
  0x15   :  { %1553 = vmatprep.subr.bf16.mxu0 %v1695_v21  ;;  %1650 = vmatpush3.bf16.msra.mxu1 %v1895_v18  ;;  %v1635_v59 = vpack.c.bf16 %v505_v58, %v504_v57  ;;  %v999_v57 = vadd.s32 8, %v1851_v3  ;;  %s1403_s26 = sshll.u32 %s1816_s25, 4  ;;  %s1404_s26 = int_to_ptr.vmem [resolvable:$true] %s1403_s26 }
  0x16   :  { %1643 = vmatprep.subr.bf16.mxu1 %v1907_v22  ;;  %s1785_s27 = scalar_lea.vmem %s1404_s26, 128  ;;  %p1790_p1 = scmp.lt.s32.totalorder %s1404_s26, %s1404_s26 }
  0x17   :  { %1554 = vmatpush3.bf16.msra.mxu0 %v1695_v21  ;;  %p1786_p0 = scmp.ne.s32.totalorder %s1404_s26, %s1785_s27  ;;  %p1791_p2 = scmp.lt.s32.totalorder %s1785_s27, %s1785_s27 }
  0x18   :  { %73 = vbcast.lane.b32.xlu1 %v67_v23, 264  ;;  %69 = vbcast.lane.b32.xlu0 %v67_v23, 256 }
  0x19   :  { %1555 = vmatprep.subr.bf16.mxu0 %v1697_v25  ;;  %1651 = vmatpush3.bf16.msra.mxu1 %v1907_v22  ;;  %p1792_p3 = por %p1791_p2, %p1790_p1 }
  0x1a   :  { %1644 = vmatprep.subr.bf16.mxu1 %v1919_v26 }
  0x1b   :  { %1556 = vmatpush3.bf16.msra.mxu0 %v1697_v25  ;;  %p1793_p4 = pnand %p1792_p3, %p1786_p0 }
  0x1c   :  { %84 = vbcast.lane.b32.xlu1 %v78_v27, 264  ;;  %80 = vbcast.lane.b32.xlu0 %v78_v27, 256 }
  0x1d   :  { %1557 = vmatprep.subr.bf16.mxu0 %v1699_v29  ;;  %1652 = vmatpush3.bf16.msra.mxu1 %v1919_v26 }
  0x1e   :  { %1645 = vmatprep.subr.bf16.mxu1 %v1931_v30 }
  0x1f   :  { %1558 = vmatpush3.bf16.msra.mxu0 %v1699_v29 }
  0x20   :  { %95 = vbcast.lane.b32.xlu1 %v89_v31, 264  ;;  %91 = vbcast.lane.b32.xlu0 %v89_v31, 256 }
  0x21   :  { %1575 = vmatprep.subr.bf16.mxu0 %v1866_v10  ;;  %1653 = vmatpush3.bf16.msra.mxu1 %v1931_v30 }
  0x22   :  { %1646 = vmatprep.subr.bf16.mxu1 %v1940_v33 }
  0x24   :  { %106 = vbcast.lane.b32.xlu1 %v100_v34, 264  ;;  %102 = vbcast.lane.b32.xlu0 %v100_v34, 256 }
  0x25   :  { %1654 = vmatpush3.bf16.msra.mxu1 %v1940_v33 }
  0x26   :  { %1636 = vmatprep.subr.bf16.mxu1 %v1635_v59 }
  0x7a   :  { %v1947_v35 = vpop.permute.xlu1 %36  ;;  %v1949_v36 = vpop.permute.xlu0 %25 }
  0x7b   :  { %vm112_vm0 = vcmp.eq.s32.totalorder %v1947_v35, %v1952_v37  ;;  %vm110_vm4 = vcmp.eq.s32.totalorder %v1949_v36, %v1952_v37 }
  0x7e   :  { %v1954_v38 = vpop.permute.xlu1 %40  ;;  %v1956_v39 = vpop.permute.xlu0 %29 }
  0x7f   :  { %vm113_vm1 = vcmp.eq.s32.totalorder %v1954_v38, %v1952_v37  ;;  %vm111_vm2 = vcmp.eq.s32.totalorder %v1956_v39, %v1952_v37 }
  0x80   :  { %vm1964_vm3 = vmpackc.low %vm113_vm1, %vm112_vm0 }
  0x81   :  { %vm1970_vm5 = vmpackc.low %vm111_vm2, %vm110_vm4 }
  0x82   :  { %1559 = vmatprep.mubr.msk.bf16.mxu0 %vm1970_vm5, %v1809_v42  ;;  %v1976_v43 = vpop.permute.xlu1 %51  ;;  %v1978_v44 = vpop.permute.xlu0 %47 }
  0x83   :  { %vm115_vm6 = vcmp.eq.s32.totalorder %v1976_v43, %v1952_v37  ;;  %1560 = vmatmul.mubr.msk.bf16.vlgmr.msra.gmra.mrb[0].mxu0 %vm1964_vm3, %v1809_v42  ;;  %vm114_vm7 = vcmp.eq.s32.totalorder %v1978_v44, %v1952_v37 }
  0x84   :  { %1576 = vmatpush3.bf16.msra.mxu0 %v1866_v10  ;;  %vm1987_vm8 = vmpackc.low %vm115_vm6, %vm114_vm7 }
  0x85   :  { %1577 = vmatprep.subr.bf16.mxu0 %v1872_v12  ;;  %1563 = vmatprep.mubr.msk.bf16.mxu0 %vm1987_vm8, %v1809_v42 }
  0x86   :  { %v1994_v46 = vpop.permute.xlu1 %62  ;;  %v1996_v47 = vpop.permute.xlu0 %58 }
  0x87   :  { %vm117_vm9 = vcmp.eq.s32.totalorder %v1994_v46, %v1952_v37  ;;  %vm116_vm10 = vcmp.eq.s32.totalorder %v1996_v47, %v1952_v37 }
  0x88   :  { %1578 = vmatpush3.bf16.msra.mxu0 %v1872_v12  ;;  %vm2003_vm11 = vmpackc.low %vm117_vm9, %vm116_vm10 }
  0x89   :  { %1579 = vmatprep.subr.bf16.mxu0 %v1883_v14 }
  0x8a   :  { %v2008_v49 = vpop.permute.xlu1 %73  ;;  %v2010_v50 = vpop.permute.xlu0 %69 }
  0x8b   :  { %vm119_vm12 = vcmp.eq.s32.totalorder %v2008_v49, %v1952_v37  ;;  %1564 = vmatmul.mubr.msk.bf16.gmra.mrb[4].mxu0 %vm2003_vm11, %v1809_v42  ;;  %vm118_vm13 = vcmp.eq.s32.totalorder %v2010_v50, %v1952_v37 }
  0x8c   :  { %1580 = vmatpush3.bf16.msra.mxu0 %v1883_v14  ;;  %vm1443_vm14 = vmpackc.low %vm119_vm12, %vm118_vm13  ;;  %vm732_vm12 = vcmp.eq.s32.totalorder %v1949_v36, 1  ;;  %vm780_vm13 = vcmask 15360  }
  0x8d   :  { %1581 = vmatprep.subr.bf16.mxu0 %v1895_v18  ;;  %1567 = vmatprep.mubr.msk.bf16.mxu0 %vm1443_vm14, %v1809_v42 }
  0x8e   :  { %v2020_v51 = vpop.permute.xlu1 %84  ;;  %1599 = vmatprep.mubr.msk.bf16.mxu1 %vm1443_vm14, %v1809_v42  ;;  %v2022_v52 = vpop.permute.xlu0 %80  ;;  %vm734_vm14 = vcmp.eq.s32.totalorder %v1947_v35, 1 }
  0x8f   :  { %vm121_vm15 = vcmp.eq.s32.totalorder %v2020_v51, %v1952_v37  ;;  %vm120_vm0 = vcmp.eq.s32.totalorder %v2022_v52, %v1952_v37 }
  0x90   :  { %1582 = vmatpush3.bf16.msra.mxu0 %v1895_v18  ;;  %vm1445_vm1 = vmpackc.low %vm121_vm15, %vm120_vm0  ;;  %vm735_vm15 = vcmp.eq.s32.totalorder %v1954_v38, 1  ;;  %vm737_vm0 = vcmp.eq.s32.totalorder %v1976_v43, 1 }
  0x91   :  { %1583 = vmatprep.subr.bf16.mxu0 %v1907_v22  ;;  %1600 = vmatmul.mubr.msk.bf16.vlgmr.msra.gmra.mrb[0].mxu1 %vm1445_vm1, %v1809_v42 }
  0x92   :  { %v2030_v53 = vpop.permute.xlu1 %95  ;;  %v2032_v54 = vpop.permute.xlu0 %91  ;;  %1638 = vmatpush3.bf16.msra.mxu1 %v1635_v59 }
  0x93   :  { %vm123_vm2 = vcmp.eq.s32.totalorder %v2030_v53, %v1952_v37  ;;  %1568 = vmatmul.mubr.msk.bf16.gmra.mrb[8].mxu0 %vm1445_vm1, %v1809_v42  ;;  %vm122_vm4 = vcmp.eq.s32.totalorder %v2032_v54, %v1952_v37  ;;  %vm736_vm1 = vcmp.eq.s32.totalorder %v1978_v44, 1 }
  0x94   :  { %1584 = vmatpush3.bf16.msra.mxu0 %v1907_v22  ;;  %vm1447_vm6 = vmpackc.low %vm123_vm2, %vm122_vm4  ;;  %vm739_vm2 = vcmp.eq.s32.totalorder %v1994_v46, 1  ;;  %vm738_vm4 = vcmp.eq.s32.totalorder %v1996_v47, 1 }
  0x95   :  { %1585 = vmatprep.subr.bf16.mxu0 %v1919_v26  ;;  %1571 = vmatprep.mubr.msk.bf16.mxu0 %vm1447_vm6, %v1809_v42 }
  0x96   :  { %v2040_v55 = vpop.permute.xlu1 %106  ;;  %1603 = vmatprep.mubr.msk.bf16.mxu1 %vm1447_vm6, %v1809_v42  ;;  %v2042_v56 = vpop.permute.xlu0 %102  ;;  %vm741_vm6 = vcmp.eq.s32.totalorder %v2008_v49, 1 }
  0x97   :  { %vm125_vm7 = vcmp.eq.s32.totalorder %v2040_v55, %v1952_v37  ;;  %vm124_vm9 = vcmp.eq.s32.totalorder %v2042_v56, %v1952_v37 }
  0x98   :  { %1586 = vmatpush3.bf16.msra.mxu0 %v1919_v26  ;;  %vm1449_vm10 = vmpackc.low %vm125_vm7, %vm124_vm9  ;;  %vm740_vm7 = vcmp.eq.s32.totalorder %v2010_v50, 1  ;;  %vm743_vm9 = vcmp.eq.s32.totalorder %v2020_v51, 1 }
  0x99   :  { %1587 = vmatprep.subr.bf16.mxu0 %v1931_v30  ;;  %1604 = vmatmul.mubr.msk.bf16.gmra.mrb[4].mxu1 %vm1449_vm10, %v1809_v42 }
  0x9b   :  { %1572 = vmatmul.mubr.msk.bf16.gmra.mrb[12].mxu0 %vm1449_vm10, %v1809_v42  ;;  %vm742_vm10 = vcmp.eq.s32.totalorder %v2022_v52, 1 }
  0x9c   :  { %1588 = vmatpush3.bf16.msra.mxu0 %v1931_v30  ;;  %1591 = vmatprep.mubr.msk.bf16.mxu0 %vm1970_vm5, %v1809_v42  ;;  %vm1001_vm5 = vcmp.eq.s32.totalorder %v999_v57, %v1952_v37 }
  0x9d   :  { %1589 = vmatprep.subr.bf16.mxu0 %v1940_v33 }
  0xa0   :  { %1590 = vmatpush3.bf16.msra.mxu0 %v1940_v33 }
  0xa3   :  { %1592 = vmatmul.mubr.msk.bf16.vlgmr.msra.gmra.mrb[0].mxu0 %vm1964_vm3, %v1809_v42  ;;  %vm1000_vm3 = vcmp.eq.s32.totalorder %v1851_v3, %v1952_v37 }
  0xa4   :  { %1595 = vmatprep.mubr.msk.bf16.mxu0 %vm1987_vm8, %v1809_v42  ;;  %vm554_vm8 = vcmask 130048  }
  0xab   :  { %1596 = vmatmul.mubr.msk.bf16.gmra.mrb[4].mxu0 %vm2003_vm11, %v1809_v42  ;;  %vm733_vm11 = vcmp.eq.s32.totalorder %v1956_v39, 1 }
 0x164   :  { %v1601_v60 = vpop.f32.mrb[0].mxu1 }
 0x165   :  { %v457_v61 = vpop.f32.mrb[1].mxu1 }
 0x166   :  { %v1569_v62 = vpop.f32.mrb[8].mxu0  ;;  %v1602_v63 = vpop.f32.mrb[2].mxu1 }
 0x167   :  { %v2067_v0 = vadd.f32 %v1601_v60, %v1569_v62  ;;  %v312_v1 = vpop.f32.mrb[9].mxu0  ;;  %v460_v2 = vpop.f32.mrb[3].mxu1  ;;  %v1811_v62 = vmov 0.0  }
 0x168   :  { %v2069_v4 = vadd.f32 %v457_v61, %v312_v1  ;;  %v1570_v5 = vpop.f32.mrb[10].mxu0  ;;  %v1492_v1 = vsel %vm1001_vm5, 1.0, %v1811_v62  ;;  %v750_v35 = vsel %vm734_vm14, -10000.0, %v1811_v62  ;;  %vm744_vm5 = vcmp.eq.s32.totalorder %v2032_v54, 1 }
 0x169   :  { %v2071_v6 = vadd.f32 %v1602_v63, %v1570_v5  ;;  %v315_v7 = vpop.f32.mrb[11].mxu0  ;;  %v1491_v63 = vsel %vm1000_vm3, 1.0, %v1811_v62  ;;  %vm745_vm3 = vcmp.eq.s32.totalorder %v2030_v53, 1  ;;  %vm1360_vm14 = vcmask 1041409  }
 0x16a   :  { %v2073_v8 = vadd.f32 %v460_v2, %v315_v7  ;;  %v1679_v5 = vpack.i.bf16 %v1492_v1, %v1491_v63  ;;  %v761_v51 = vsel %vm745_vm3, -10000.0, %v1811_v62 }
 0x16c   :  { %v1605_v9 = vpop.f32.mrb[4].mxu1 }
 0x16d   :  { %v473_v10 = vpop.f32.mrb[5].mxu1 }
 0x16e   :  { %v1573_v11 = vpop.f32.mrb[12].mxu0  ;;  %v1606_v12 = vpop.f32.mrb[6].mxu1 }
 0x16f   :  { %v2075_v13 = vadd.f32 %v1605_v9, %v1573_v11  ;;  %v328_v14 = vpop.f32.mrb[13].mxu0  ;;  %v476_v15 = vpop.f32.mrb[7].mxu1 }
 0x170   :  { %v2077_v16 = vadd.f32 %v473_v10, %v328_v14  ;;  %v1574_v17 = vpop.f32.mrb[14].mxu0 }
 0x171   :  { %v2079_v18 = vadd.f32 %v1606_v12, %v1574_v17  ;;  %v331_v19 = vpop.f32.mrb[15].mxu0 }
 0x172   :  { %v2081_v20 = vadd.f32 %v476_v15, %v331_v19 }
 0x176   :  { %v2083_v21 = vpop.f32.mrb[0].mxu0 }
 0x177   :  { %v2085_v22 = vpop.f32.mrb[1].mxu0 }
 0x178   :  { %1705 = vtanh.f32 %v2085_v22  ;;  %v2088_v23 = vpop.f32.mrb[2].mxu0 }
 0x179   :  { %v2090_v24 = vpop.f32.mrb[3].mxu0 }
 0x17a   :  { %1707 = vtanh.f32 %v2090_v24 }
 0x17b   :  { %1709 = vtanh.f32 %v2083_v21 }
 0x17c   :  { %1711 = vtanh.f32 %v2088_v23 }
 0x17e   :  { %v2095_v25 = vpop.f32.mrb[4].mxu0 }
 0x17f   :  { %v2097_v26 = vpop.f32.mrb[5].mxu0 }
 0x180   :  { %1713 = vtanh.f32 %v2097_v26  ;;  %v2100_v27 = vpop.f32.mrb[6].mxu0 }
 0x181   :  { %v2102_v28 = vpop.f32.mrb[7].mxu0 }
 0x182   :  { %v1706_v29 = vpop.eup %1705  ;;  %1715 = vtanh.f32 %v2102_v28 }
 0x183   :  { %522 = vrot.lane.b32.xlu0 %v1706_v29, %s1810_s3  ;;  %1717 = vtanh.f32 %v2095_v25 }
 0x184   :  { %v1708_v30 = vpop.eup %1707  ;;  %1719 = vtanh.f32 %v2100_v27 }
 0x185   :  { %524 = vrot.lane.b32.xlu1 %v1708_v30, %s1810_s3  ;;  %v1710_v31 = vpop.eup %1709  ;;  %1721 = vtanh.f32 %v2069_v4 }
 0x186   :  { %v1712_v32 = vpop.eup %1711  ;;  %1723 = vtanh.f32 %v2073_v8 }
 0x187   :  { %526 = vrot.lane.b32.xlu0 %v1710_v31, %s1810_s3  ;;  %1725 = vtanh.f32 %v2067_v0 }
 0x188   :  { %1727 = vtanh.f32 %v2071_v6 }
 0x189   :  { %528 = vrot.lane.b32.xlu1 %v1712_v32, %s1810_s3  ;;  %1729 = vtanh.f32 %v2077_v16 }
 0x18a   :  { %v1714_v33 = vpop.eup %1713  ;;  %1731 = vtanh.f32 %v2081_v20 }
 0x18b   :  { %530 = vrot.lane.b32.xlu0 %v1714_v33, %s1810_s3  ;;  %1733 = vtanh.f32 %v2075_v13 }
 0x18c   :  { %v1716_v34 = vpop.eup %1715  ;;  %1735 = vtanh.f32 %v2079_v18 }
 0x18d   :  { %532 = vrot.lane.b32.xlu1 %v1716_v34, %s1810_s3  ;;  %v1718_v40 = vpop.eup %1717  ;;  %v1813_v34 = vmov 1  }
 0x18e   :  { %v1720_v41 = vpop.eup %1719  ;;  %1685 = vset.pattern.permute.xlu1 %v1813_v34  ;;  %1684 = vset.pattern.permute.xlu0 %v1813_v34 }
 0x18f   :  { %534 = vrot.lane.b32.xlu0 %v1718_v40, %s1810_s3  ;;  %v1722_v42 = vpop.eup %1721 }
 0x190   :  { %v1724_v45 = vpop.eup %1723 }
 0x191   :  { %536 = vrot.lane.b32.xlu1 %v1720_v41, %s1810_s3  ;;  %v1726_v48 = vpop.eup %1725  ;;  %v749_v41 = vsel %vm733_vm11, -10000.0, %v1811_v62  ;;  %vm746_vm11 = vcmp.eq.s32.totalorder %v2042_v56, 1 }
 0x192   :  { %v1728_v58 = vpop.eup %1727  ;;  %v762_v54 = vsel %vm746_vm11, -10000.0, %v1811_v62 }
 0x193   :  { %538 = vrot.lane.b32.xlu0 %v1722_v42, %s1810_s3  ;;  %v1730_v59 = vpop.eup %1729 }
 0x194   :  { %v1732_v60 = vpop.eup %1731 }
 0x195   :  { %540 = vrot.lane.b32.xlu1 %v1724_v45, %s1810_s3  ;;  %v1734_v61 = vpop.eup %1733 }
 0x196   :  { %v1736_v2 = vpop.eup %1735 }
 0x197   :  { %542 = vrot.lane.b32.xlu0 %v1726_v48, %s1810_s3  ;;  %v748_v48 = vsel %vm732_vm12, -10000.0, %v1811_v62  ;;  %vm1014_vm12 = vcmask 261120  }
 0x199   :  { %544 = vrot.lane.b32.xlu1 %v1728_v58, %s1810_s3 }
 0x19b   :  { %546 = vrot.lane.b32.xlu0 %v1730_v59, %s1810_s3  ;;  %v751_v59 = vsel %vm735_vm15, -10000.0, %v1811_v62  ;;  %vm1362_vm15 = vcmask 1042434  }
 0x19d   :  { %548 = vrot.lane.b32.xlu1 %v1732_v60, %s1810_s3 }
 0x19f   :  { %550 = vrot.lane.b32.xlu0 %v1734_v61, %s1810_s3 }
 0x1a1   :  { %552 = vrot.lane.b32.xlu1 %v1736_v2, %s1810_s3 }
 0x1a5   :  { %1680 = vrot.lane.b32.xlu1 %v1679_v5, %s1812_s23  ;;  %v753_v5 = vsel %vm737_vm0, -10000.0, %v1811_v62  ;;  %vm1364_vm0 = vcmask 1043459  }
 0x1f5   :  { %v523_v3 = vpop.permute.xlu0 %522 }
 0x1f6   :  { %1611 = vmatprep.mubr.msk.f32.mxu1 %vm554_vm8, %v523_v3  ;;  %v752_v3 = vsel %vm736_vm1, -10000.0, %v1811_v62  ;;  %vm1366_vm1 = vcmask 1044484  }
 0x1f7   :  { %v525_v37 = vpop.permute.xlu1 %524 }
 0x1f8   :  { %1612 = vmatmul.mubr.msk.f32.vlgmr.msra.gmra.mrb[8].mxu1 %vm554_vm8, %v525_v37 }
 0x1f9   :  { %v527_v7 = vpop.permute.xlu0 %526 }
 0x1fa   :  { %1614 = vmatprep.mubr.msk.f32.mxu1 %vm554_vm8, %v527_v7 }
 0x1fb   :  { %v529_v9 = vpop.permute.xlu1 %528 }
 0x1fc   :  { %1615 = vmatmul.mubr.msk.f32.gmra.mrb[10].mxu1 %vm554_vm8, %v529_v9 }
 0x1fd   :  { %v531_v10 = vpop.permute.xlu0 %530 }
 0x1fe   :  { %1617 = vmatprep.mubr.msk.f32.mxu1 %vm554_vm8, %v531_v10  ;;  %v755_v10 = vsel %vm739_vm2, -10000.0, %v1811_v62  ;;  %vm1368_vm2 = vcmask 1045509  }
 0x1ff   :  { %v533_v11 = vpop.permute.xlu1 %532 }
 0x200   :  { %1618 = vmatmul.mubr.msk.f32.gmra.mrb[12].mxu1 %vm554_vm8, %v533_v11  ;;  %v754_v11 = vsel %vm738_vm4, -10000.0, %v1811_v62  ;;  %vm1370_vm4 = vcmask 1046534  }
 0x201   :  { %v535_v12 = vpop.permute.xlu0 %534 }
 0x202   :  { %1620 = vmatprep.mubr.msk.f32.mxu1 %vm554_vm8, %v535_v12  ;;  %v757_v12 = vsel %vm741_vm6, -10000.0, %v1811_v62  ;;  %vm1372_vm6 = vcmask 1047559  }
 0x203   :  { %v537_v14 = vpop.permute.xlu1 %536 }
 0x204   :  { %1621 = vmatmul.mubr.msk.f32.gmra.mrb[14].mxu1 %vm554_vm8, %v537_v14 }
 0x205   :  { %v539_v15 = vpop.permute.xlu0 %538 }
 0x206   :  { %1623 = vmatprep.mubr.msk.f32.mxu1 %vm554_vm8, %v539_v15 }
 0x207   :  { %v541_v17 = vpop.permute.xlu1 %540 }
 0x208   :  { %1624 = vmatmul.mubr.msk.f32.gmra.mrb[16].mxu1 %vm554_vm8, %v541_v17 }
 0x209   :  { %v543_v19 = vpop.permute.xlu0 %542 }
 0x20a   :  { %1626 = vmatprep.mubr.msk.f32.mxu1 %vm554_vm8, %v543_v19 }
 0x20b   :  { %v545_v29 = vpop.permute.xlu1 %544 }
 0x20c   :  { %1627 = vmatmul.mubr.msk.f32.gmra.mrb[18].mxu1 %vm554_vm8, %v545_v29  ;;  %v756_v29 = vsel %vm740_vm7, -10000.0, %v1811_v62  ;;  %vm1394_vm7 = vcmask 785408  }
 0x20d   :  { %v547_v30 = vpop.permute.xlu0 %546 }
 0x20e   :  { %1629 = vmatprep.mubr.msk.f32.mxu1 %vm554_vm8, %v547_v30 }
 0x20f   :  { %v549_v31 = vpop.permute.xlu1 %548 }
 0x210   :  { %1630 = vmatmul.mubr.msk.f32.gmra.mrb[20].mxu1 %vm554_vm8, %v549_v31 }
 0x211   :  { %v551_v32 = vpop.permute.xlu0 %550 }
 0x212   :  { %1632 = vmatprep.mubr.msk.f32.mxu1 %vm554_vm8, %v551_v32 }
 0x213   :  { %v553_v33 = vpop.permute.xlu1 %552 }
 0x214   :  { %1633 = vmatmul.mubr.msk.f32.gmra.mrb[22].mxu1 %vm554_vm8, %v553_v33  ;;  %vm747_vm8 = vcmp.eq.s32.totalorder %v2040_v55, 1 }
 0x215   :  { %v763_v52 = vsel %vm747_vm8, -10000.0, %v1811_v62 }
 0x2cb   :  { %v1613_v40 = vpop.f32.mrb[8].mxu1 }
 0x2cc   :  { %v2160_v42 = vadd.f32 %v1613_v40, %v749_v41  ;;  %v653_v45 = vpop.f32.mrb[9].mxu1 }
 0x2cd   :  { %v2163_v57 = vadd.f32 %v748_v48, %v653_v45  ;;  %v759_v45 = vsel %vm743_vm9, -10000.0, %v1811_v62 }
 0x2ce   :  { %v782_v39 = vsel %vm780_vm13, %v2160_v42, -inf }
 0x2cf   :  { %v781_v36 = vsel %vm780_vm13, %v2163_v57, -inf  ;;  %v1616_v58 = vpop.f32.mrb[10].mxu1 }
 0x2d0   :  { %v783_v38 = vmax.f32 %v781_v36, %v782_v39  ;;  %v2173_v60 = vadd.f32 %v1616_v58, %v751_v59  ;;  %v663_v61 = vpop.f32.mrb[11].mxu1 }
 0x2d1   :  { %v2176_v63 = vadd.f32 %v750_v35, %v663_v61  ;;  %v758_v35 = vsel %vm742_vm10, -10000.0, %v1811_v62 }
 0x2d2   :  { %v784_v1 = vrot.slane %v783_v38, 4  ;;  %v791_v2 = vsel %vm780_vm13, %v2173_v60, -inf }
 0x2d3   :  { %v790_v43 = vsel %vm780_vm13, %v2176_v63, -inf  ;;  %v1619_v44 = vpop.f32.mrb[12].mxu1 }
 0x2d4   :  { %v785_v37 = vmax.f32 %v783_v38, %v784_v1  ;;  %v792_v7 = vmax.f32 %v790_v43, %v791_v2  ;;  %v2187_v9 = vadd.f32 %v1619_v44, %v753_v5  ;;  %v673_v47 = vpop.f32.mrb[13].mxu1 }
 0x2d5   :  { %v2189_v49 = vadd.f32 %v752_v3, %v673_v47  ;;  %v760_v3 = vsel %vm744_vm5, -10000.0, %v1811_v62 }
 0x2d6   :  { %v786_v14 = vrot.slane %v785_v37, 2  ;;  %v793_v15 = vrot.slane %v792_v7, 4  ;;  %v800_v17 = vsel %vm780_vm13, %v2187_v9, -inf }
 0x2d7   :  { %v799_v19 = vsel %vm780_vm13, %v2189_v49, -inf  ;;  %v1622_v46 = vpop.f32.mrb[14].mxu1 }
 0x2d8   :  { %v787_v30 = vmax.f32 %v785_v37, %v786_v14  ;;  %v794_v31 = vmax.f32 %v792_v7, %v793_v15  ;;  %v801_v32 = vmax.f32 %v799_v19, %v800_v17  ;;  %v2206_v33 = vadd.f32 %v1622_v46, %v755_v10  ;;  %v683_v40 = vpop.f32.mrb[15].mxu1 }
 0x2d9   :  { %v2210_v41 = vadd.f32 %v754_v11, %v683_v40 }
 0x2da   :  { %v788_v48 = vrot.slane %v787_v30, 1  ;;  %v795_v39 = vrot.slane %v794_v31, 2  ;;  %v802_v50 = vrot.slane %v801_v32, 4  ;;  %v809_v36 = vsel %vm780_vm13, %v2206_v33, -inf }
 0x2db   :  { %v808_v58 = vsel %vm780_vm13, %v2210_v41, -inf  ;;  %v1625_v59 = vpop.f32.mrb[16].mxu1 }
 0x2dc   :  { %v789_v38 = vmax.f32 %v787_v30, %v788_v48  ;;  %v796_v61 = vmax.f32 %v794_v31, %v795_v39  ;;  %v803_v1 = vmax.f32 %v801_v32, %v802_v50  ;;  %v810_v2 = vmax.f32 %v808_v58, %v809_v36  ;;  %v693_v43 = vpop.f32.mrb[17].mxu1 }
 0x2dd   :  { %v2226_v44 = vadd.f32 %v1625_v59, %v757_v12  ;;  %v2228_v5 = vadd.f32 %v756_v29, %v693_v43 }
 0x2de   :  { %v853_v53 = vsub.f32 %v2163_v57, %v789_v38  ;;  %v854_v37 = vsub.f32 %v2160_v42, %v789_v38  ;;  %v797_v7 = vrot.slane %v796_v61, 1  ;;  %v804_v47 = vrot.slane %v803_v1, 2 }
 0x2df   :  { %v811_v10 = vrot.slane %v810_v2, 4  ;;  %v818_v11 = vsel %vm780_vm13, %v2226_v44, -inf  ;;  %v817_v12 = vsel %vm780_vm13, %v2228_v5, -inf  ;;  %v1628_v14 = vpop.f32.mrb[18].mxu1 }
 0x2e0   :  { %v869_v55 = vmul.f32 1.442695, %v853_v53  ;;  %v871_v15 = vmul.f32 1.442695, %v854_v37  ;;  %v798_v17 = vmax.f32 %v796_v61, %v797_v7  ;;  %v805_v57 = vmax.f32 %v803_v1, %v804_v47  ;;  %v703_v19 = vpop.f32.mrb[19].mxu1 }
 0x2e1   :  { %v812_v42 = vmax.f32 %v810_v2, %v811_v10  ;;  %v819_v46 = vmax.f32 %v817_v12, %v818_v11  ;;  %v2245_v29 = vadd.f32 %v1628_v14, %v759_v45  ;;  %v2247_v30 = vadd.f32 %v758_v35, %v703_v19 }
 0x2e2   :  { %1737 = vpow2.f32 %v869_v55  ;;  %v855_v31 = vsub.f32 %v2176_v63, %v798_v17  ;;  %v856_v32 = vsub.f32 %v2173_v60, %v798_v17  ;;  %v806_v40 = vrot.slane %v805_v57, 1 }
 0x2e3   :  { %1739 = vpow2.f32 %v871_v15  ;;  %v813_v56 = vrot.slane %v812_v42, 2  ;;  %v820_v62 = vrot.slane %v819_v46, 4  ;;  %v827_v48 = vsel %vm780_vm13, %v2245_v29, -inf  ;;  %v1631_v39 = vpop.f32.mrb[20].mxu1 }
 0x2e4   :  { %v873_v50 = vmul.f32 1.442695, %v855_v31  ;;  %v875_v36 = vmul.f32 1.442695, %v856_v32  ;;  %v807_v58 = vmax.f32 %v805_v57, %v806_v40  ;;  %v826_v45 = vsel %vm780_vm13, %v2247_v30, -inf  ;;  %v713_v59 = vpop.f32.mrb[21].mxu1 }
 0x2e5   :  { %v814_v35 = vmax.f32 %v812_v42, %v813_v56  ;;  %v821_v38 = vmax.f32 %v819_v46, %v820_v62  ;;  %v828_v63 = vmax.f32 %v826_v45, %v827_v48  ;;  %v2255_v61 = vadd.f32 %v1631_v39, %v761_v51 }
 0x2e6   :  { %1741 = vpow2.f32 %v873_v50  ;;  %v857_v60 = vsub.f32 %v2189_v49, %v807_v58  ;;  %v858_v1 = vsub.f32 %v2187_v9, %v807_v58  ;;  %v2259_v2 = vadd.f32 %v760_v3, %v713_v59 }
 0x2e7   :  { %1743 = vpow2.f32 %v875_v36  ;;  %v815_v43 = vrot.slane %v814_v35, 1  ;;  %v822_v53 = vrot.slane %v821_v38, 2  ;;  %v829_v37 = vrot.slane %v828_v63, 4  ;;  %v1634_v7 = vpop.f32.mrb[22].mxu1 }
 0x2e8   :  { %v877_v47 = vmul.f32 1.442695, %v857_v60  ;;  %v879_v10 = vmul.f32 1.442695, %v858_v1  ;;  %v836_v11 = vsel %vm780_vm13, %v2255_v61, -inf  ;;  %v835_v51 = vsel %vm780_vm13, %v2259_v2, -inf }
 0x2e9   :  { %v816_v12 = vmax.f32 %v814_v35, %v815_v43  ;;  %v823_v14 = vmax.f32 %v821_v38, %v822_v53  ;;  %v830_v49 = vmax.f32 %v828_v63, %v829_v37  ;;  %v837_v55 = vmax.f32 %v835_v51, %v836_v11  ;;  %v723_v9 = vpop.f32.mrb[23].mxu1 }
 0x2ea   :  { %1745 = vpow2.f32 %v877_v47  ;;  %v2265_v3 = vadd.f32 %v1634_v7, %v763_v52  ;;  %v2267_v15 = vadd.f32 %v762_v54, %v723_v9 }
 0x2eb   :  { %1747 = vpow2.f32 %v879_v10  ;;  %v859_v17 = vsub.f32 %v2210_v41, %v816_v12  ;;  %v860_v57 = vsub.f32 %v2206_v33, %v816_v12  ;;  %v824_v19 = vrot.slane %v823_v14, 1 }
 0x2ec   :  { %v2271_v42 = vpop.eup %1737  ;;  %v831_v46 = vrot.slane %v830_v49, 2  ;;  %v838_v31 = vrot.slane %v837_v55, 4  ;;  %v845_v32 = vsel %vm780_vm13, %v2265_v3, -inf  ;;  %v844_v40 = vsel %vm780_vm13, %v2267_v15, -inf }
 0x2ed   :  { %v2277_v52 = vpop.eup %1739  ;;  %v901_v54 = vsel %vm780_vm13, %v2271_v42, 0.0  ;;  %v881_v56 = vmul.f32 1.442695, %v859_v17  ;;  %v883_v41 = vmul.f32 1.442695, %v860_v57  ;;  %v825_v62 = vmax.f32 %v823_v14, %v824_v19 }
 0x2ee   :  { %v902_v33 = vsel %vm780_vm13, %v2277_v52, 0.0  ;;  %v832_v48 = vmax.f32 %v830_v49, %v831_v46  ;;  %v839_v39 = vmax.f32 %v837_v55, %v838_v31  ;;  %v846_v50 = vmax.f32 %v844_v40, %v845_v32 }
 0x2ef   :  { %v903_v36 = vadd.f32 %v902_v33, %v901_v54  ;;  %1749 = vpow2.f32 %v881_v56  ;;  %v861_v58 = vsub.f32 %v2228_v5, %v825_v62  ;;  %v862_v45 = vsub.f32 %v2226_v44, %v825_v62 }
 0x2f0   :  { %v2285_v59 = vpop.eup %1741  ;;  %1751 = vpow2.f32 %v883_v41  ;;  %v833_v35 = vrot.slane %v832_v48, 1  ;;  %v840_v38 = vrot.slane %v839_v39, 2  ;;  %v847_v63 = vrot.slane %v846_v50, 4 }
 0x2f1   :  { %v2287_v60 = vpop.eup %1743  ;;  %v904_v1 = vrot.slane %v903_v36, 4  ;;  %v910_v43 = vsel %vm780_vm13, %v2285_v59, 0.0  ;;  %v885_v53 = vmul.f32 1.442695, %v861_v58  ;;  %v887_v37 = vmul.f32 1.442695, %v862_v45 }
 0x2f2   :  { %v911_v7 = vsel %vm780_vm13, %v2287_v60, 0.0  ;;  %v834_v5 = vmax.f32 %v832_v48, %v833_v35  ;;  %v841_v47 = vmax.f32 %v839_v39, %v840_v38  ;;  %v848_v44 = vmax.f32 %v846_v50, %v847_v63 }
 0x2f3   :  { %v905_v10 = vadd.f32 %v904_v1, %v903_v36  ;;  %v912_v11 = vadd.f32 %v911_v7, %v910_v43  ;;  %1753 = vpow2.f32 %v885_v53 }
 0x2f4   :  { %v2293_v51 = vpop.eup %1745  ;;  %1755 = vpow2.f32 %v887_v37  ;;  %v863_v12 = vsub.f32 %v2247_v30, %v834_v5  ;;  %v864_v14 = vsub.f32 %v2245_v29, %v834_v5  ;;  %v842_v49 = vrot.slane %v841_v47, 1 }
 0x2f5   :  { %v2297_v55 = vpop.eup %1747  ;;  %v913_v9 = vrot.slane %v912_v11, 4  ;;  %v919_v17 = vsel %vm780_vm13, %v2293_v51, 0.0  ;;  %v849_v57 = vrot.slane %v848_v44, 2  ;;  %v906_v19 = vrot.slane %v905_v10, 2 }
 0x2f6   :  { %v920_v46 = vsel %vm780_vm13, %v2297_v55, 0.0  ;;  %v889_v31 = vmul.f32 1.442695, %v863_v12  ;;  %v891_v32 = vmul.f32 1.442695, %v864_v14  ;;  %v843_v40 = vmax.f32 %v841_v47, %v842_v49 }
 0x2f7   :  { %v914_v54 = vadd.f32 %v913_v9, %v912_v11  ;;  %v921_v56 = vadd.f32 %v920_v46, %v919_v17  ;;  %v850_v30 = vmax.f32 %v848_v44, %v849_v57  ;;  %v907_v41 = vadd.f32 %v906_v19, %v905_v10 }
 0x2f8   :  { %1757 = vpow2.f32 %v889_v31  ;;  %v865_v29 = vsub.f32 %v2259_v2, %v843_v40  ;;  %v866_v62 = vsub.f32 %v2255_v61, %v843_v40 }
 0x2f9   :  { %v2305_v33 = vpop.eup %1749  ;;  %v922_v48 = vrot.slane %v921_v56, 4  ;;  %1759 = vpow2.f32 %v891_v32  ;;  %v851_v39 = vrot.slane %v850_v30, 1  ;;  %v908_v50 = vrot.slane %v907_v41, 1 }
 0x2fa   :  { %v2307_v36 = vpop.eup %1751  ;;  %v928_v58 = vsel %vm780_vm13, %v2305_v33, 0.0  ;;  %v893_v45 = vmul.f32 1.442695, %v865_v29  ;;  %v895_v35 = vmul.f32 1.442695, %v866_v62  ;;  %v915_v38 = vrot.slane %v914_v54, 2 }
 0x2fb   :  { %v923_v63 = vadd.f32 %v922_v48, %v921_v56  ;;  %v929_v2 = vsel %vm780_vm13, %v2307_v36, 0.0  ;;  %v852_v1 = vmax.f32 %v850_v30, %v851_v39  ;;  %v909_v61 = vadd.f32 %v908_v50, %v907_v41 }
 0x2fc   :  { %v930_v43 = vadd.f32 %v929_v2, %v928_v58  ;;  %1761 = vpow2.f32 %v893_v45  ;;  %v916_v53 = vadd.f32 %v915_v38, %v914_v54 }
 0x2fd   :  { %v2313_v37 = vpop.eup %1753  ;;  %1763 = vpow2.f32 %v895_v35  ;;  %v867_v7 = vsub.f32 %v2267_v15, %v852_v1  ;;  %v868_v5 = vsub.f32 %v2265_v3, %v852_v1  ;;  %v924_v47 = vrot.slane %v923_v63, 2 }
 0x2fe   :  { %v2317_v44 = vpop.eup %1755  ;;  %v931_v10 = vrot.slane %v930_v43, 4  ;;  %v937_v11 = vsel %vm780_vm13, %v2313_v37, 0.0  ;;  %1765 = vrcp.f32 %v909_v61  ;;  %v917_v12 = vrot.slane %v916_v53, 1 }
 0x2ff   :  { %v938_v14 = vsel %vm780_vm13, %v2317_v44, 0.0  ;;  %v897_v49 = vmul.f32 1.442695, %v867_v7  ;;  %v899_v9 = vmul.f32 1.442695, %v868_v5  ;;  %v925_v17 = vadd.f32 %v924_v47, %v923_v63 }
 0x300   :  { %v932_v57 = vadd.f32 %v931_v10, %v930_v43  ;;  %v939_v19 = vadd.f32 %v938_v14, %v937_v11  ;;  %v918_v15 = vadd.f32 %v917_v12, %v916_v53 }
 0x301   :  { %1767 = vpow2.f32 %v897_v49  ;;  %v926_v3 = vrot.slane %v925_v17, 1 }
 0x302   :  { %v2323_v46 = vpop.eup %1757  ;;  %v940_v31 = vrot.slane %v939_v19, 4  ;;  %1769 = vpow2.f32 %v899_v9  ;;  %v933_v32 = vrot.slane %v932_v57, 2 }
 0x303   :  { %v2325_v40 = vpop.eup %1759  ;;  %v946_v54 = vsel %vm780_vm13, %v2323_v46, 0.0  ;;  %1771 = vrcp.f32 %v918_v15  ;;  %v927_v56 = vadd.f32 %v926_v3, %v925_v17 }
 0x304   :  { %v941_v30 = vadd.f32 %v940_v31, %v939_v19  ;;  %v947_v41 = vsel %vm780_vm13, %v2325_v40, 0.0  ;;  %v934_v29 = vadd.f32 %v933_v32, %v932_v57 }
 0x305   :  { %v948_v62 = vadd.f32 %v947_v41, %v946_v54  ;;  %1773 = vrcp.f32 %v927_v56 }
 0x306   :  { %v2331_v48 = vpop.eup %1761  ;;  %v935_v39 = vrot.slane %v934_v29, 1  ;;  %v942_v50 = vrot.slane %v941_v30, 2 }
 0x307   :  { %v2333_v58 = vpop.eup %1763  ;;  %v949_v45 = vrot.slane %v948_v62, 4  ;;  %v955_v35 = vsel %vm780_vm13, %v2331_v48, 0.0 }
 0x308   :  { %v1766_v38 = vpop.eup %1765  ;;  %v956_v63 = vsel %vm780_vm13, %v2333_v58, 0.0  ;;  %v936_v2 = vadd.f32 %v935_v39, %v934_v29  ;;  %v943_v1 = vadd.f32 %v942_v50, %v941_v30 }
 0x309   :  { %v950_v61 = vadd.f32 %v949_v45, %v948_v62  ;;  %v957_v43 = vadd.f32 %v956_v63, %v955_v35  ;;  %v2340_v53 = vmul.f32 %v1766_v38, %v2271_v42  ;;  %v2343_v7 = vmul.f32 %v1766_v38, %v2277_v52 }
 0x30a   :  { %1775 = vrcp.f32 %v936_v2  ;;  %v944_v5 = vrot.slane %v943_v1, 1 }
 0x30b   :  { %v1768_v47 = vpop.eup %1767  ;;  %v958_v10 = vrot.slane %v957_v43, 4  ;;  %1201 = vperm.xlu0 %1684, %v2340_v53   ;;  %1205 = vperm.xlu1 %1685, %v2343_v7   ;;  %v951_v11 = vrot.slane %v950_v61, 2 }
 0x30c   :  { %v1770_v12 = vpop.eup %1769  ;;  %v964_v14 = vsel %vm780_vm13, %v1768_v47, 0.0  ;;  %v945_v49 = vadd.f32 %v944_v5, %v943_v1 }
 0x30d   :  { %v1772_v9 = vpop.eup %1771  ;;  %v959_v17 = vadd.f32 %v958_v10, %v957_v43  ;;  %v965_v42 = vsel %vm780_vm13, %v1770_v12, 0.0  ;;  %v952_v57 = vadd.f32 %v951_v11, %v950_v61  ;;  %vm1127_vm13 = vcmask 392192  }
 0x30e   :  { %v966_v52 = vadd.f32 %v965_v42, %v964_v14  ;;  %v984_v19 = vmul.f32 %v1772_v9, %v2287_v60  ;;  %v983_v15 = vmul.f32 %v1772_v9, %v2285_v59  ;;  %1777 = vrcp.f32 %v945_v49 }
 0x30f   :  { %v1774_v3 = vpop.eup %1773  ;;  %v953_v31 = vrot.slane %v952_v57, 1  ;;  %v960_v32 = vrot.slane %v959_v17, 2  ;;  %v1814_v14 = vmov 0  }
 0x310   :  { %v967_v54 = vrot.slane %v966_v52, 4  ;;  %1213 = vperm.xlu0 %1684, %v984_v19   ;;  %1209 = vperm.xlu1 %1685, %v983_v15   ;;  %v986_v56 = vmul.f32 %v1774_v3, %v2297_v55  ;;  %v985_v30 = vmul.f32 %v1774_v3, %v2293_v51 }
 0x311   :  { %v954_v41 = vadd.f32 %v953_v31, %v952_v57  ;;  %v961_v29 = vadd.f32 %v960_v32, %v959_v17 }
 0x312   :  { %v968_v62 = vadd.f32 %v967_v54, %v966_v52 }
 0x313   :  { %1779 = vrcp.f32 %v954_v41  ;;  %v962_v39 = vrot.slane %v961_v29, 1 }
 0x314   :  { %v1776_v50 = vpop.eup %1775  ;;  %1221 = vperm.xlu0 %1684, %v986_v56   ;;  %1217 = vperm.xlu1 %1685, %v985_v30   ;;  %v969_v59 = vrot.slane %v968_v62, 2 }
 0x315   :  { %v988_v60 = vmul.f32 %v1776_v50, %v2307_v36  ;;  %v987_v45 = vmul.f32 %v1776_v50, %v2305_v33  ;;  %v963_v35 = vadd.f32 %v962_v39, %v961_v29 }
 0x316   :  { %v970_v38 = vadd.f32 %v969_v59, %v968_v62 }
 0x317   :  { %1781 = vrcp.f32 %v963_v35 }
 0x318   :  { %v1778_v63 = vpop.eup %1777  ;;  %1229 = vperm.xlu0 %1684, %v988_v60   ;;  %1225 = vperm.xlu1 %1685, %v987_v45   ;;  %v971_v51 = vrot.slane %v970_v38, 1 }
 0x319   :  { %v990_v55 = vmul.f32 %v1778_v63, %v2317_v44  ;;  %v989_v2 = vmul.f32 %v1778_v63, %v2313_v37 }
 0x31a   :  { %v972_v1 = vadd.f32 %v971_v51, %v970_v38 }
 0x31c   :  { %1237 = vperm.xlu0 %1684, %v990_v55   ;;  %1233 = vperm.xlu1 %1685, %v989_v2   ;;  %1783 = vrcp.f32 %v972_v1 }
 0x31d   :  { %v1780_v61 = vpop.eup %1779 }
 0x31e   :  { %v992_v36 = vmul.f32 %v1780_v61, %v2325_v40  ;;  %v991_v33 = vmul.f32 %v1780_v61, %v2323_v46  ;;  %v1681_v46 = vpop.permute.xlu1 %1680 }
 0x31f   :  { %v2364_v40 = vunpack.i.h.bf16 %v1681_v46 }
 0x320   :  { %1245 = vperm.xlu0 %1684, %v992_v36   ;;  %1241 = vperm.xlu1 %1685, %v991_v33  }
 0x321   :  { %v1782_v43 = vpop.eup %1781  ;;  %v2413_v38 = vsel %vm1014_vm12, %v2100_v27, %v2364_v40  ;;  %v2427_v27 = vsel %vm1014_vm12, %v2073_v8, %v2364_v40 }
 0x322   :  { %v994_v5 = vmul.f32 %v1782_v43, %v2333_v58  ;;  %v993_v10 = vmul.f32 %v1782_v43, %v2331_v48  ;;  %v2366_v48 = vunpack.i.l.bf16 %v1681_v46  ;;  %v2439_v46 = vsel %vm1014_vm12, %v2071_v6, %v2364_v40 }
 0x324   :  { %1253 = vperm.xlu0 %1684, %v994_v5   ;;  %1249 = vperm.xlu1 %1685, %v993_v10   ;;  %v2418_v63 = vsel %vm1014_vm12, %v2095_v25, %v2366_v48 }
 0x326   :  { %v1784_v44 = vpop.eup %1783 }
 0x327   :  { %v996_v37 = vmul.f32 %v1784_v44, %v1770_v12  ;;  %v995_v11 = vmul.f32 %v1784_v44, %v1768_v47  ;;  %v2376_v47 = vsel %vm1014_vm12, %v2090_v24, %v2364_v40  ;;  %v2390_v24 = vsel %vm1014_vm12, %v2083_v21, %v2366_v48 }
 0x328   :  { %v2404_v21 = vsel %vm1014_vm12, %v2097_v26, %v2366_v48 }
 0x329   :  { %1261 = vperm.xlu1 %1685, %v996_v37   ;;  %1257 = vperm.xlu0 %1684, %v995_v11  }
 0x32d   :  { %1687 = vset.pattern.permute.xlu1 %v1814_v14  ;;  %1686 = vset.pattern.permute.xlu0 %v1814_v14 }
 0x32e   :  { %1038 = vperm.xlu1 %1687, %v2343_v7   ;;  %1033 = vperm.xlu0 %1686, %v2340_v53   ;;  %v2371_v53 = vsel %vm1014_vm12, %v2085_v22, %v2366_v48  ;;  %v2385_v22 = vsel %vm1014_vm12, %v2088_v23, %v2364_v40  ;;  %v2399_v23 = vsel %vm1014_vm12, %v2102_v28, %v2364_v40 }
 0x332   :  { %1043 = vperm.xlu1 %1687, %v983_v15   ;;  %1048 = vperm.xlu0 %1686, %v984_v19  }
 0x336   :  { %1053 = vperm.xlu1 %1687, %v985_v30   ;;  %1058 = vperm.xlu0 %1686, %v986_v56  }
 0x33a   :  { %1063 = vperm.xlu1 %1687, %v987_v45   ;;  %1068 = vperm.xlu0 %1686, %v988_v60  }
 0x33e   :  { %1073 = vperm.xlu1 %1687, %v989_v2   ;;  %1078 = vperm.xlu0 %1686, %v990_v55  }
 0x342   :  { %1083 = vperm.xlu1 %1687, %v991_v33   ;;  %1088 = vperm.xlu0 %1686, %v992_v36  }
 0x346   :  { %1093 = vperm.xlu1 %1687, %v993_v10   ;;  %1098 = vperm.xlu0 %1686, %v994_v5  }
 0x34a   :  { %1103 = vperm.xlu1 %1687, %v995_v11   ;;  %1108 = vperm.xlu0 %1686, %v996_v37   ;;  %v2432_v37 = vsel %vm1014_vm12, %v2069_v4, %v2366_v48 }
 0x34e   :  { %1688 = vset.pattern.permute.xlu0 %v1813_v34 }
 0x38a   :  { %v1202_v58 = vpop.permute.xlu0 %1201  ;;  %v1206_v7 = vpop.permute.xlu1 %1205 }
 0x38b   :  { %v1264_v34 = vmul.f32 %v1202_v58, %v2371_v53  ;;  %v1265_v12 = vmul.f32 %v1206_v7, %v2376_v47 }
 0x38d   :  { %v1280_v49 = vsel %vm1127_vm13, %v1264_v34, 0.0  ;;  %v1281_v9 = vsel %vm1127_vm13, %v1265_v12, 0.0  ;;  %v2444_v34 = vsel %vm1014_vm12, %v2067_v0, %v2366_v48  ;;  %v2453_v0 = vsel %vm1014_vm12, %v2081_v20, %v2364_v40 }
 0x38e   :  { %v1282_v17 = vadd.f32 %v1281_v9, %v1280_v49 }
 0x38f   :  { %v1214_v42 = vpop.permute.xlu0 %1213  ;;  %v1210_v57 = vpop.permute.xlu1 %1209 }
 0x390   :  { %v1283_v52 = vrot.slane %v1282_v17, 4  ;;  %v1267_v19 = vmul.f32 %v1214_v42, %v2385_v22  ;;  %v1266_v15 = vmul.f32 %v1210_v57, %v2390_v24 }
 0x392   :  { %v1284_v3 = vadd.f32 %v1283_v52, %v1282_v17  ;;  %v1290_v31 = vsel %vm1127_vm13, %v1267_v19, 0.0  ;;  %v1289_v32 = vsel %vm1127_vm13, %v1266_v15, 0.0 }
 0x393   :  { %v1291_v54 = vadd.f32 %v1290_v31, %v1289_v32  ;;  %v1222_v56 = vpop.permute.xlu0 %1221  ;;  %v1218_v30 = vpop.permute.xlu1 %1217 }
 0x394   :  { %v1285_v41 = vrot.slane %v1284_v3, 2  ;;  %v1269_v29 = vmul.f32 %v1222_v56, %v2399_v23  ;;  %v1268_v62 = vmul.f32 %v1218_v30, %v2404_v21 }
 0x395   :  { %v1292_v39 = vrot.slane %v1291_v54, 4 }
 0x396   :  { %v1286_v50 = vadd.f32 %v1285_v41, %v1284_v3  ;;  %v1299_v59 = vsel %vm1127_vm13, %v1269_v29, 0.0  ;;  %v1298_v60 = vsel %vm1127_vm13, %v1268_v62, 0.0  ;;  %v2461_v41 = vsel %vm1014_vm12, %v2077_v16, %v2366_v48 }
 0x397   :  { %v1293_v45 = vadd.f32 %v1292_v39, %v1291_v54  ;;  %v1300_v28 = vadd.f32 %v1299_v59, %v1298_v60  ;;  %v1230_v35 = vpop.permute.xlu0 %1229  ;;  %v1226_v26 = vpop.permute.xlu1 %1225 }
 0x398   :  { %v1271_v51 = vmul.f32 %v1230_v35, %v2413_v38  ;;  %v1270_v55 = vmul.f32 %v1226_v26, %v2418_v63  ;;  %v1287_v61 = vrot.slane %v1286_v50, 1 }
 0x399   :  { %v1294_v2 = vrot.slane %v1293_v45, 2  ;;  %v1301_v1 = vrot.slane %v1300_v28, 4 }
 0x39a   :  { %v1308_v36 = vsel %vm1127_vm13, %v1271_v51, 0.0  ;;  %v1307_v33 = vsel %vm1127_vm13, %v1270_v55, 0.0  ;;  %v1288_v12 = vadd.f32 %v1287_v61, %v1286_v50 }
 0x39b   :  { %v1295_v43 = vadd.f32 %v1294_v2, %v1293_v45  ;;  %v1302_v5 = vadd.f32 %v1301_v1, %v1300_v28  ;;  %v1309_v25 = vadd.f32 %v1308_v36, %v1307_v33  ;;  %v1238_v10 = vpop.permute.xlu0 %1237  ;;  %v1234_v44 = vpop.permute.xlu1 %1233  ;;  %v2471_v33 = vsel %vm1014_vm12, %v2075_v13, %v2366_v48 }
 0x39c   :  { %v1273_v11 = vmul.f32 %v1238_v10, %v2427_v27  ;;  %v1272_v14 = vmul.f32 %v1234_v44, %v2432_v37  ;;  %v2477_v44 = vsel %vm1014_vm12, %v2079_v18, %v2364_v40 }
 0x39d   :  { %v1296_v8 = vrot.slane %v1295_v43, 1  ;;  %v1303_v58 = vrot.slane %v1302_v5, 2  ;;  %v1310_v7 = vrot.slane %v1309_v25, 4 }
 0x39e   :  { %v1317_v4 = vsel %vm1127_vm13, %v1273_v11, 0.0  ;;  %v1316_v49 = vsel %vm1127_vm13, %v1272_v14, 0.0 }
 0x39f   :  { %v1297_v9 = vadd.f32 %v1296_v8, %v1295_v43  ;;  %v1304_v17 = vadd.f32 %v1303_v58, %v1302_v5  ;;  %v1311_v42 = vadd.f32 %v1310_v7, %v1309_v25  ;;  %v1318_v57 = vadd.f32 %v1317_v4, %v1316_v49  ;;  %v1246_v6 = vpop.permute.xlu0 %1245  ;;  %v1242_v52 = vpop.permute.xlu1 %1241 }
 0x3a0   :  { %v1275_v19 = vmul.f32 %v1246_v6, %v2439_v46  ;;  %v1274_v15 = vmul.f32 %v1242_v52, %v2444_v34 }
 0x3a1   :  { %v1383_v3 = vsel %vm1360_vm14, %v1297_v9, %v1288_v12  ;;  %v1305_v31 = vrot.slane %v1304_v17, 1  ;;  %v1312_v32 = vrot.slane %v1311_v42, 2  ;;  %v1319_v54 = vrot.slane %v1318_v57, 4 }
 0x3a2   :  { %v1326_v56 = vsel %vm1127_vm13, %v1275_v19, 0.0  ;;  %v1325_v30 = vsel %vm1127_vm13, %v1274_v15, 0.0 }
 0x3a3   :  { %v1306_v29 = vadd.f32 %v1305_v31, %v1304_v17  ;;  %v1313_v62 = vadd.f32 %v1312_v32, %v1311_v42  ;;  %v1320_v39 = vadd.f32 %v1319_v54, %v1318_v57  ;;  %v1327_v20 = vadd.f32 %v1326_v56, %v1325_v30  ;;  %v1254_v50 = vpop.permute.xlu0 %1253  ;;  %v1250_v59 = vpop.permute.xlu1 %1249 }
 0x3a4   :  { %v1277_v60 = vmul.f32 %v1254_v50, %v2453_v0  ;;  %v1276_v45 = vmul.f32 %v1250_v59, %v2461_v41 }
 0x3a5   :  { %v1314_v28 = vrot.slane %v1313_v62, 1  ;;  %v1328_v35 = vrot.slane %v1327_v20, 4  ;;  %v1384_v26 = vsel %vm1362_vm15, %v1306_v29, %v1383_v3  ;;  %v1321_v2 = vrot.slane %v1320_v39, 2 }
 0x3a6   :  { %v1335_v51 = vsel %vm1127_vm13, %v1277_v60, 0.0  ;;  %v1334_v16 = vsel %vm1127_vm13, %v1276_v45, 0.0 }
 0x3a7   :  { %v1315_v55 = vadd.f32 %v1314_v28, %v1313_v62  ;;  %v1329_v1 = vadd.f32 %v1328_v35, %v1327_v20  ;;  %v1336_v61 = vadd.f32 %v1335_v51, %v1334_v16  ;;  %v1322_v8 = vadd.f32 %v1321_v2, %v1320_v39 }
 0x3a8   :  { %v1258_v36 = vpop.permute.xlu0 %1257  ;;  %v1262_v43 = vpop.permute.xlu1 %1261 }
 0x3a9   :  { %v1330_v5 = vrot.slane %v1329_v1, 2  ;;  %v1337_v25 = vrot.slane %v1336_v61, 4  ;;  %v1278_v10 = vmul.f32 %v1258_v36, %v2471_v33  ;;  %v1279_v11 = vmul.f32 %v1262_v43, %v2477_v44 }
 0x3aa   :  { %v1385_v14 = vsel %vm1364_vm0, %v1315_v55, %v1384_v26  ;;  %v1323_v40 = vrot.slane %v1322_v8, 1 }
 0x3ab   :  { %v1338_v58 = vadd.f32 %v1337_v25, %v1336_v61  ;;  %v1343_v7 = vsel %vm1127_vm13, %v1278_v10, 0.0  ;;  %v1331_v13 = vadd.f32 %v1330_v5, %v1329_v1  ;;  %v1344_v48 = vsel %vm1127_vm13, %v1279_v11, 0.0 }
 0x3ac   :  { %v1345_v4 = vadd.f32 %v1344_v48, %v1343_v7 }
 0x3ad   :  { %v1339_v12 = vrot.slane %v1338_v58, 2  ;;  %v1034_v49 = vpop.permute.xlu0 %1033  ;;  %v1039_v9 = vpop.permute.xlu1 %1038  ;;  %v1332_v6 = vrot.slane %v1331_v13, 1 }
 0x3ae   :  { %v1111_v17 = vmul.f32 %v1034_v49, %v2371_v53  ;;  %v1112_v18 = vmul.f32 %v1039_v9, %v2376_v47  ;;  %v1346_v57 = vrot.slane %v1345_v4, 4  ;;  %v1324_v53 = vadd.f32 %v1323_v40, %v1322_v8 }
 0x3af   :  { %v1340_v42 = vadd.f32 %v1339_v12, %v1338_v58  ;;  %v1333_v62 = vadd.f32 %v1332_v6, %v1331_v13 }
 0x3b0   :  { %v1128_v52 = vsel %vm1127_vm13, %v1111_v17, 0.0  ;;  %v1129_v19 = vsel %vm1127_vm13, %v1112_v18, 0.0  ;;  %v1347_v15 = vadd.f32 %v1346_v57, %v1345_v4  ;;  %v1386_v55 = vsel %vm1366_vm1, %v1324_v53, %v1385_v14 }
 0x3b1   :  { %v1130_v3 = vadd.f32 %v1129_v19, %v1128_v52  ;;  %v1049_v31 = vpop.permute.xlu0 %1048  ;;  %v1044_v32 = vpop.permute.xlu1 %1043  ;;  %v1341_v54 = vrot.slane %v1340_v42, 1  ;;  %v1387_v61 = vsel %vm1368_vm2, %v1333_v62, %v1386_v55 }
 0x3b2   :  { %v1114_v56 = vmul.f32 %v1049_v31, %v2385_v22  ;;  %v1113_v30 = vmul.f32 %v1044_v32, %v2390_v24  ;;  %v1348_v29 = vrot.slane %v1347_v15, 2 }
 0x3b3   :  { %v1131_v47 = vrot.slane %v1130_v3, 4  ;;  %v1342_v24 = vadd.f32 %v1341_v54, %v1340_v42 }
 0x3b4   :  { %v1138_v39 = vsel %vm1127_vm13, %v1114_v56, 0.0  ;;  %v1137_v20 = vsel %vm1127_vm13, %v1113_v30, 0.0  ;;  %v1349_v50 = vadd.f32 %v1348_v29, %v1347_v15 }
 0x3b5   :  { %v1132_v59 = vadd.f32 %v1131_v47, %v1130_v3  ;;  %v1139_v60 = vadd.f32 %v1138_v39, %v1137_v20  ;;  %v1059_v45 = vpop.permute.xlu0 %1058  ;;  %v1054_v28 = vpop.permute.xlu1 %1053  ;;  %v1388_v8 = vsel %vm1370_vm4, %v1342_v24, %v1387_v61 }
 0x3b6   :  { %v1116_v35 = vmul.f32 %v1059_v45, %v2399_v23  ;;  %v1115_v22 = vmul.f32 %v1054_v28, %v2404_v21  ;;  %v1350_v16 = vrot.slane %v1349_v50, 1 }
 0x3b7   :  { %v1133_v26 = vrot.slane %v1132_v59, 2  ;;  %v1140_v51 = vrot.slane %v1139_v60, 4 }
 0x3b8   :  { %v1147_v2 = vsel %vm1127_vm13, %v1116_v35, 0.0  ;;  %v1146_v1 = vsel %vm1127_vm13, %v1115_v22, 0.0  ;;  %v1351_v21 = vadd.f32 %v1350_v16, %v1349_v50 }
 0x3b9   :  { %v1134_v36 = vadd.f32 %v1133_v26, %v1132_v59  ;;  %v1141_v43 = vadd.f32 %v1140_v51, %v1139_v60  ;;  %v1148_v5 = vadd.f32 %v1147_v2, %v1146_v1  ;;  %v1069_v23 = vpop.permute.xlu0 %1068  ;;  %v1064_v25 = vpop.permute.xlu1 %1063 }
 0x3ba   :  { %v1118_v10 = vmul.f32 %v1069_v23, %v2413_v38  ;;  %v1117_v11 = vmul.f32 %v1064_v25, %v2418_v63  ;;  %v1389_v7 = vsel %vm1372_vm6, %v1351_v21, %v1388_v8 }
 0x3bb   :  { %v1142_v14 = vrot.slane %v1141_v43, 2  ;;  %v1149_v58 = vrot.slane %v1148_v5, 4  ;;  %v1135_v13 = vrot.slane %v1134_v36, 1  ;;  %1390 = vrot.lane.b32.xlu1 %v1389_v7, %s1815_s24 }
 0x3bc   :  { %v1156_v48 = vsel %vm1127_vm13, %v1118_v10, 0.0  ;;  %v1155_v12 = vsel %vm1127_vm13, %v1117_v11, 0.0 }
 0x3bd   :  { %v1143_v4 = vadd.f32 %v1142_v14, %v1141_v43  ;;  %v1150_v49 = vadd.f32 %v1149_v58, %v1148_v5  ;;  %v1157_v9 = vadd.f32 %v1156_v48, %v1155_v12  ;;  %v1079_v17 = vpop.permute.xlu0 %1078  ;;  %v1074_v38 = vpop.permute.xlu1 %1073  ;;  %v1136_v6 = vadd.f32 %v1135_v13, %v1134_v36 }
 0x3be   :  { %v1120_v63 = vmul.f32 %v1079_v17, %v2427_v27  ;;  %v1119_v18 = vmul.f32 %v1074_v38, %v2432_v37 }
 0x3bf   :  { %v1144_v40 = vrot.slane %v1143_v4, 1  ;;  %v1151_v42 = vrot.slane %v1150_v49, 2  ;;  %v1158_v57 = vrot.slane %v1157_v9, 4 }
 0x3c0   :  { %v1165_v52 = vsel %vm1127_vm13, %v1120_v63, 0.0  ;;  %v1164_v19 = vsel %vm1127_vm13, %v1119_v18, 0.0 }
 0x3c1   :  { %v1145_v15 = vadd.f32 %v1144_v40, %v1143_v4  ;;  %v1152_v3 = vadd.f32 %v1151_v42, %v1150_v49  ;;  %v1159_v31 = vadd.f32 %v1158_v57, %v1157_v9  ;;  %v1166_v32 = vadd.f32 %v1165_v52, %v1164_v19  ;;  %v1089_v54 = vpop.permute.xlu0 %1088  ;;  %v1084_v56 = vpop.permute.xlu1 %1083 }
 0x3c2   :  { %v1122_v30 = vmul.f32 %v1089_v54, %v2439_v46  ;;  %v1121_v27 = vmul.f32 %v1084_v56, %v2444_v34 }
 0x3c3   :  { %v1361_v37 = vsel %vm1360_vm14, %v1145_v15, %v1136_v6  ;;  %v1153_v53 = vrot.slane %v1152_v3, 1  ;;  %v1160_v29 = vrot.slane %v1159_v31, 2  ;;  %v1167_v47 = vrot.slane %v1166_v32, 4 }
 0x3c4   :  { %v1174_v62 = vsel %vm1127_vm13, %v1122_v30, 0.0  ;;  %v1173_v39 = vsel %vm1127_vm13, %v1121_v27, 0.0 }
 0x3c5   :  { %v1154_v20 = vadd.f32 %v1153_v53, %v1152_v3  ;;  %v1161_v50 = vadd.f32 %v1160_v29, %v1159_v31  ;;  %v1168_v59 = vadd.f32 %v1167_v47, %v1166_v32  ;;  %v1175_v60 = vadd.f32 %v1174_v62, %v1173_v39  ;;  %v1099_v45 = vpop.permute.xlu0 %1098  ;;  %v1094_v28 = vpop.permute.xlu1 %1093 }
 0x3c6   :  { %v1124_v35 = vmul.f32 %v1099_v45, %v2453_v0  ;;  %v1123_v46 = vmul.f32 %v1094_v28, %v2461_v41 }
 0x3c7   :  { %v1363_v34 = vsel %vm1362_vm15, %v1154_v20, %v1361_v37  ;;  %v1162_v22 = vrot.slane %v1161_v50, 1  ;;  %v1169_v24 = vrot.slane %v1168_v59, 2  ;;  %v1176_v26 = vrot.slane %v1175_v60, 4 }
 0x3c8   :  { %v1183_v51 = vsel %vm1127_vm13, %v1124_v35, 0.0  ;;  %v1182_v16 = vsel %vm1127_vm13, %v1123_v46, 0.0 }
 0x3c9   :  { %v1163_v55 = vadd.f32 %v1162_v22, %v1161_v50  ;;  %v1170_v2 = vadd.f32 %v1169_v24, %v1168_v59  ;;  %v1177_v1 = vadd.f32 %v1176_v26, %v1175_v60  ;;  %v1184_v61 = vadd.f32 %v1183_v51, %v1182_v16  ;;  %v1109_v36 = vpop.permute.xlu0 %1108  ;;  %v1104_v43 = vpop.permute.xlu1 %1103 }
 0x3ca   :  { %v1126_v5 = vmul.f32 %v1109_v36, %v2477_v44  ;;  %v1125_v0 = vmul.f32 %v1104_v43, %v2471_v33 }
 0x3cb   :  { %v1171_v41 = vrot.slane %v1170_v2, 1  ;;  %v1178_v23 = vrot.slane %v1177_v1, 2  ;;  %v1185_v25 = vrot.slane %v1184_v61, 4  ;;  %v1365_v21 = vsel %vm1364_vm0, %v1163_v55, %v1363_v34 }
 0x3cc   :  { %v1192_v10 = vsel %vm1127_vm13, %v1126_v5, 0.0  ;;  %v1191_v11 = vsel %vm1127_vm13, %v1125_v0, 0.0 }
 0x3cd   :  { %v1172_v8 = vadd.f32 %v1171_v41, %v1170_v2  ;;  %v1179_v14 = vadd.f32 %v1178_v23, %v1177_v1  ;;  %v1186_v58 = vadd.f32 %v1185_v25, %v1184_v61  ;;  %v1193_v7 = vadd.f32 %v1192_v10, %v1191_v11 }
 0x3cf   :  { %v1180_v13 = vrot.slane %v1179_v14, 1  ;;  %v1187_v48 = vrot.slane %v1186_v58, 2  ;;  %v1194_v12 = vrot.slane %v1193_v7, 4  ;;  %v1367_v44 = vsel %vm1366_vm1, %v1172_v8, %v1365_v21 }
 0x3d1   :  { %v1181_v4 = vadd.f32 %v1180_v13, %v1179_v14  ;;  %v1188_v33 = vadd.f32 %v1187_v48, %v1186_v58  ;;  %v1195_v49 = vadd.f32 %v1194_v12, %v1193_v7 }
 0x3d3   :  { %v1189_v9 = vrot.slane %v1188_v33, 1  ;;  %v1196_v17 = vrot.slane %v1195_v49, 2  ;;  %v1369_v38 = vsel %vm1368_vm2, %v1181_v4, %v1367_v44 }
 0x3d5   :  { %v1190_v63 = vadd.f32 %v1189_v9, %v1188_v33  ;;  %v1197_v18 = vadd.f32 %v1196_v17, %v1195_v49 }
 0x3d7   :  { %v1198_v40 = vrot.slane %v1197_v18, 1  ;;  %v1371_v42 = vsel %vm1370_vm4, %v1190_v63, %v1369_v38 }
 0x3d9   :  { %v1199_v57 = vadd.f32 %v1198_v40, %v1197_v18 }
 0x3db   :  { %v1373_v6 = vsel %vm1372_vm6, %v1199_v57, %v1371_v42 }
 0x42d   :  { %v1391_v52 = vpop.permute.xlu1 %1390 }
 0x42e   :  { %v1393_v19 = vsel %vm1127_vm13, %v1373_v6, %v1391_v52 }
 0x42f   :  { %v1395_v15 = vsel %vm1394_vm7, %v1393_v19, 0.0 }
 0x430   :  { %1396 = vst [vmem:[#allocation2] sm:$0xff] %v1395_v15 }
 0x431   :  { %1796 = shalt.err (!%p1793_p4)
}
 0x432   :  { %s1797_s30 = scalar_lea.hbm %s2543_s4, 128 }
 0x433   :  { %p1798_p5 = scmp.ne.s32.totalorder %s2543_s4, %s1797_s30  ;;  %p1801_p6 = scmp.lt.u32.totalorder %s1797_s30, %s2543_s4 }
 0x435   :  { %p1803_p7 = pnand %p1801_p6, %p1798_p5 }
 0x437   :  { %1806 = shalt.err (!%p1803_p7)
}
 0x438   :  { %1406 = dma.vmem_to_hbm [thread:$0]  %s1404_s26, 128, %s2543_s4, [#allocation3]  }
 0x439   :  { %1807 = dma.done.wait [#allocation3], 128  }
 0x43a   :  { %1808 = vsyncadd [#allocation3], 4294967168 }
 0x43b   :  { %1410 = vsyncpa [#allocation3], 1 }

</bundles_post_ra>
